<compile_context>
chip_gen: v6e
topology: v6e:2x2x1
jax: 0.10.0
libtpu: 0.0.40
codegen_flags: <defaults>
</compile_context>

<pallas_src>
import functools

import jax
import jax.numpy as jnp
from jax.experimental import pallas as pl
from jax.experimental.pallas import tpu as pltpu

H1, H2 = 400, 300
H1_PAD = 512    # 400 padded up to a multiple of 128
H2_PAD = 384    # 300 padded up to a multiple of 128


def _round_up(x, m):
    return (x + m - 1) // m * m


def _actor_kernel(s_ref, w1_ref, b1_ref, w2_ref, b2_ref, w3_ref, b3_ref,
                  o_ref, *, max_action):
    # In-kernel f32 -> bf16 cast (VPU op, hidden under the MXU work); the
    # wrapper feeds raw f32 state, so there is no extra HBM pass outside.
    x = s_ref[...].astype(jnp.bfloat16)

    # Layer 1: relu(state @ W1 + b1) -- bf16 operands, f32 MXU accumulation.
    h1 = jnp.dot(x, w1_ref[...], preferred_element_type=jnp.float32)
    h1 = jnp.maximum(h1 + b1_ref[...], 0.0).astype(jnp.bfloat16)

    # Layer 2: relu(h1 @ W2 + b2)
    h2 = jnp.dot(h1, w2_ref[...], preferred_element_type=jnp.float32)
    h2 = jnp.maximum(h2 + b2_ref[...], 0.0).astype(jnp.bfloat16)

    # Layer 3: tanh(h2 @ W3 + b3) * max_action, stored as (tb, action_dim) f32.
    a = jnp.dot(h2, w3_ref[...], preferred_element_type=jnp.float32) + b3_ref[...]
    o_ref[...] = (jnp.tanh(a) * max_action).astype(o_ref.dtype)


def actor_forward(state, params, action_dim, max_action, *, block_b=512):
    """Fused Actor forward. state: (B, S) f32 -> (B, action_dim) f32."""
    B, S = state.shape
    w1, b1, w2, b2, w3, b3 = params

    # Batch tile: aim for >= 2 grid steps (so v7x's two TensorCores both get
    # work), keep it a multiple of 16 rows (bf16 sublane packing) regardless
    # of the caller-supplied block_b, and cap it so activations + buffers stay
    # far inside even v7x's 64 MiB VMEM.
    tb = _round_up(min(block_b, _round_up(pl.cdiv(B, 2), 16)), 16)
    grid = (pl.cdiv(B, tb),)

    flops = 2 * B * (S * H1_PAD + H1_PAD * H2_PAD + H2_PAD * action_dim)
    bytes_accessed = (
        B * S * 4                                            # f32 state
        + sum(int(p.size) * p.dtype.itemsize for p in params)  # weights/biases
        + B * action_dim * 4                                 # f32 actions
    )

    kernel = functools.partial(_actor_kernel, max_action=float(max_action))

    def run(weight_mode):
        def wspec(shape):
            # Weight/bias blocks are grid-invariant (index_map == (0, 0)):
            # single-buffer them when pipeline_mode is supported.
            if weight_mode is None:
                return pl.BlockSpec(shape, lambda i: (0, 0))
            return pl.BlockSpec(shape, lambda i: (0, 0),
                                pipeline_mode=weight_mode)

        return pl.pallas_call(
            kernel,
            out_shape=jax.ShapeDtypeStruct((B, action_dim), jnp.float32),
            grid=grid,
            in_specs=[
                pl.BlockSpec((tb, S), lambda i: (i, 0)),   # state tile (f32)
                wspec((S, H1_PAD)),                        # W1 (resident)
                wspec((1, H1_PAD)),                        # b1
                wspec((H1_PAD, H2_PAD)),                   # W2 (resident)
                wspec((1, H2_PAD)),                        # b2
                wspec((H2_PAD, action_dim)),               # W3 (resident)
                wspec((1, action_dim)),                    # b3
            ],
            out_specs=pl.BlockSpec((tb, action_dim), lambda i: (i, 0)),
            compiler_params=pltpu.CompilerParams(
                dimension_semantics=("parallel",),
                vmem_limit_bytes=32 * 1024 * 1024,
            ),
            cost_estimate=pl.CostEstimate(
                flops=flops,
                transcendentals=B * action_dim,            # tanh on the EUP
                bytes_accessed=bytes_accessed,
            ),
        )(state, w1, b1, w2, b2, w3, b3)

    try:
        return run(pl.Buffered(buffer_count=1))
    except Exception:
        # Fallback for jax builds where BlockSpec(pipeline_mode=...) is not
        # honored by the Mosaic grid pipeline; double-buffering the <1 MiB of
        # resident weights only costs a little VMEM headroom.
        return run(None)


def init_actor_params(key, state_dim, action_dim):
    """Synthetic nn.Linear-style init; weights stored transposed (in, out),
    bf16, zero-padded on the hidden dims to lane multiples (numerical no-op).
    The output layer keeps its true action_dim columns (lane-masked store is
    cheap and removes the post-kernel slice)."""
    ks = jax.random.split(key, 6)

    def uniform(k, shape, fan_in):
        bound = 1.0 / jnp.sqrt(jnp.float32(fan_in))
        return jax.random.uniform(k, shape, jnp.float32, -bound, bound)

    w1 = uniform(ks[0], (state_dim, H1), state_dim)
    b1 = uniform(ks[1], (1, H1), state_dim)
    w2 = uniform(ks[2], (H1, H2), H1)
    b2 = uniform(ks[3], (1, H2), H1)
    w3 = uniform(ks[4], (H2, action_dim), H2)
    b3 = uniform(ks[5], (1, action_dim), H2)

    def pad2(a, rows, cols, dtype):
        return jnp.pad(
            a, ((0, rows - a.shape[0]), (0, cols - a.shape[1]))
        ).astype(dtype)

    # Note: for RL state dims that are not 16-aligned (11, 17, ...) one could
    # additionally zero-pad W1 rows + state columns at init; layer 1 is <2% of
    # the FLOPs so it is left unpadded here.
    return (
        pad2(w1, state_dim, H1_PAD, jnp.bfloat16),
        pad2(b1, 1, H1_PAD, jnp.float32),
        pad2(w2, H1_PAD, H2_PAD, jnp.bfloat16),
        pad2(b2, 1, H2_PAD, jnp.float32),
        pad2(w3, H2_PAD, action_dim, jnp.bfloat16),
        b3.astype(jnp.float32),
    )


def actor_reference(state, params, action_dim, max_action):
    """Plain-JAX reference mirroring the kernel's bf16/f32 precision."""
    w1, b1, w2, b2, w3, b3 = params
    x = state.astype(jnp.bfloat16)
    h1 = jnp.maximum(
        jnp.dot(x, w1, preferred_element_type=jnp.float32) + b1, 0.0
    ).astype(jnp.bfloat16)
    h2 = jnp.maximum(
        jnp.dot(h1, w2, preferred_element_type=jnp.float32) + b2, 0.0
    ).astype(jnp.bfloat16)
    a = jnp.tanh(jnp.dot(h2, w3, preferred_element_type=jnp.float32) + b3)
    return a * max_action


if __name__ == "__main__":
    state_dim, action_dim, max_action = 16, 4, 2.0

    key = jax.random.PRNGKey(0)
    k_state, k_state2, k_params = jax.random.split(key, 3)
    params = init_actor_params(k_params, state_dim, action_dim)

    # Spec-sized small case.
    state = jax.random.normal(k_state, (2, state_dim), jnp.float32)
    act = jax.block_until_ready(
        actor_forward(state, params, action_dim, max_action))
    ref = actor_reference(state, params, action_dim, max_action)
    assert act.shape == (2, action_dim)
    assert bool(jnp.all(jnp.abs(act) <= max_action + 1e-5))
    assert jnp.allclose(act, ref, atol=1e-3, rtol=1e-3)

    # Multi-step grid + ragged last batch tile (exercises masked stores).
    state2 = jax.random.normal(k_state2, (40, state_dim), jnp.float32)
    act2 = jax.block_until_ready(
        actor_forward(state2, params, action_dim, max_action))
    ref2 = actor_reference(state2, params, action_dim, max_action)
    assert act2.shape == (40, action_dim)
    assert jnp.allclose(act2, ref2, atol=1e-3, rtol=1e-3)

    print("KERNEL_OK")
</pallas_src>

<mosaic_0001>
module attributes {stable_mosaic.version = 11 : i64} {
  func.func @_actor_kernel(%arg0: i32, %arg1: memref<16x16xf32, #tpu.memory_space<vmem>>, %arg2: memref<16x512xbf16, #tpu.memory_space<vmem>>, %arg3: memref<1x512xf32, #tpu.memory_space<vmem>>, %arg4: memref<512x384xbf16, #tpu.memory_space<vmem>>, %arg5: memref<1x384xf32, #tpu.memory_space<vmem>>, %arg6: memref<384x4xbf16, #tpu.memory_space<vmem>>, %arg7: memref<1x4xf32, #tpu.memory_space<vmem>>, %arg8: memref<16x4xf32, #tpu.memory_space<vmem>>) attributes {dimension_semantics = [#tpu.dimension_semantics<parallel>], iteration_bounds = array<i64: 1>, scalar_prefetch = 0 : i64, scratch_operands = 0 : i64, tpu.core_type = #tpu.core_type<tc>, window_params = [{transform_indices = @transform_0, window_bounds = array<i64: 16, 16>}, {pipeline_mode = #tpu.pipeline_mode<synchronous>, transform_indices = @transform_1, window_bounds = array<i64: 16, 512>}, {pipeline_mode = #tpu.pipeline_mode<synchronous>, transform_indices = @transform_2, window_bounds = array<i64: 1, 512>}, {pipeline_mode = #tpu.pipeline_mode<synchronous>, transform_indices = @transform_3, window_bounds = array<i64: 512, 384>}, {pipeline_mode = #tpu.pipeline_mode<synchronous>, transform_indices = @transform_4, window_bounds = array<i64: 1, 384>}, {pipeline_mode = #tpu.pipeline_mode<synchronous>, transform_indices = @transform_5, window_bounds = array<i64: 384, 4>}, {pipeline_mode = #tpu.pipeline_mode<synchronous>, transform_indices = @transform_6, window_bounds = array<i64: 1, 4>}, {transform_indices = @transform_7, window_bounds = array<i64: 16, 4>}]} {
    %c0 = arith.constant 0 : index
    %c0_0 = arith.constant 0 : index
    %0 = vector.load %arg1[%c0, %c0_0] : memref<16x16xf32, #tpu.memory_space<vmem>>, vector<16x16xf32>
    %1 = arith.truncf %0 : vector<16x16xf32> to vector<16x16xbf16>
    %c0_1 = arith.constant 0 : index
    %c0_2 = arith.constant 0 : index
    %2 = vector.load %arg2[%c0_1, %c0_2] : memref<16x512xbf16, #tpu.memory_space<vmem>>, vector<16x512xbf16>
    %cst = arith.constant dense<0.000000e+00> : vector<16x512xf32>
    %3 = tpu.matmul %1, %2, %cst {dimension_numbers = #tpu.dot_dimension_numbers<[1], [0], [0], [1], [0, 0, 1, 1], [], []>} : vector<16x16xbf16>, vector<16x512xbf16>, vector<16x512xf32> -> vector<16x512xf32>
    %c0_3 = arith.constant 0 : index
    %c0_4 = arith.constant 0 : index
    %4 = vector.load %arg3[%c0_3, %c0_4] : memref<1x512xf32, #tpu.memory_space<vmem>>, vector<1x512xf32>
    %5 = vector.broadcast %4 : vector<1x512xf32> to vector<16x512xf32>
    %6 = arith.addf %3, %5 : vector<16x512xf32>
    %cst_5 = arith.constant 0.000000e+00 : f32
    %7 = vector.broadcast %cst_5 : f32 to vector<16x512xf32>
    %8 = arith.maximumf %6, %7 : vector<16x512xf32>
    %9 = arith.truncf %8 : vector<16x512xf32> to vector<16x512xbf16>
    %c0_6 = arith.constant 0 : index
    %c0_7 = arith.constant 0 : index
    %10 = vector.load %arg4[%c0_6, %c0_7] : memref<512x384xbf16, #tpu.memory_space<vmem>>, vector<512x384xbf16>
    %cst_8 = arith.constant dense<0.000000e+00> : vector<16x384xf32>
    %11 = tpu.matmul %9, %10, %cst_8 {dimension_numbers = #tpu.dot_dimension_numbers<[1], [0], [0], [1], [0, 0, 1, 1], [], []>} : vector<16x512xbf16>, vector<512x384xbf16>, vector<16x384xf32> -> vector<16x384xf32>
    %c0_9 = arith.constant 0 : index
    %c0_10 = arith.constant 0 : index
    %12 = vector.load %arg5[%c0_9, %c0_10] : memref<1x384xf32, #tpu.memory_space<vmem>>, vector<1x384xf32>
    %13 = vector.broadcast %12 : vector<1x384xf32> to vector<16x384xf32>
    %14 = arith.addf %11, %13 : vector<16x384xf32>
    %cst_11 = arith.constant 0.000000e+00 : f32
    %15 = vector.broadcast %cst_11 : f32 to vector<16x384xf32>
    %16 = arith.maximumf %14, %15 : vector<16x384xf32>
    %17 = arith.truncf %16 : vector<16x384xf32> to vector<16x384xbf16>
    %c0_12 = arith.constant 0 : index
    %c0_13 = arith.constant 0 : index
    %18 = vector.load %arg6[%c0_12, %c0_13] : memref<384x4xbf16, #tpu.memory_space<vmem>>, vector<384x4xbf16>
    %cst_14 = arith.constant dense<0.000000e+00> : vector<16x4xf32>
    %19 = tpu.matmul %17, %18, %cst_14 {dimension_numbers = #tpu.dot_dimension_numbers<[1], [0], [0], [1], [0, 0, 1, 1], [], []>} : vector<16x384xbf16>, vector<384x4xbf16>, vector<16x4xf32> -> vector<16x4xf32>
    %c0_15 = arith.constant 0 : index
    %c0_16 = arith.constant 0 : index
    %20 = vector.load %arg7[%c0_15, %c0_16] : memref<1x4xf32, #tpu.memory_space<vmem>>, vector<1x4xf32>
    %21 = vector.broadcast %20 : vector<1x4xf32> to vector<16x4xf32>
    %22 = arith.addf %19, %21 : vector<16x4xf32>
    %23 = math.tanh %22 : vector<16x4xf32>
    %cst_17 = arith.constant 2.000000e+00 : f32
    %24 = vector.broadcast %cst_17 : f32 to vector<16x4xf32>
    %25 = arith.mulf %23, %24 : vector<16x4xf32>
    %c0_18 = arith.constant 0 : index
    %c0_19 = arith.constant 0 : index
    %26 = vector.load %arg8[%c0_18, %c0_19] : memref<16x4xf32, #tpu.memory_space<vmem>>, vector<16x4xf32>
    tpu.vector_store %arg8[%c0_18, %c0_19], %25 {strides = array<i32>} : memref<16x4xf32, #tpu.memory_space<vmem>>, vector<16x4xf32>,
    return
  }
  func.func @transform_0(%arg0: i32) -> (i32, i32) {
    %c0_i32 = arith.constant 0 : i32
    %c0_i32_0 = arith.constant 0 : i32
    return %arg0, %c0_i32 : i32, i32
  }
  func.func @transform_1(%arg0: i32) -> (i32, i32) {
    %c0_i32 = arith.constant 0 : i32
    %c0_i32_0 = arith.constant 0 : i32
    %c0_i32_1 = arith.constant 0 : i32
    return %c0_i32, %c0_i32_0 : i32, i32
  }
  func.func @transform_2(%arg0: i32) -> (i32, i32) {
    %c0_i32 = arith.constant 0 : i32
    %c0_i32_0 = arith.constant 0 : i32
    %c0_i32_1 = arith.constant 0 : i32
    return %c0_i32, %c0_i32_0 : i32, i32
  }
  func.func @transform_3(%arg0: i32) -> (i32, i32) {
    %c0_i32 = arith.constant 0 : i32
    %c0_i32_0 = arith.constant 0 : i32
    %c0_i32_1 = arith.constant 0 : i32
    return %c0_i32, %c0_i32_0 : i32, i32
  }
  func.func @transform_4(%arg0: i32) -> (i32, i32) {
    %c0_i32 = arith.constant 0 : i32
    %c0_i32_0 = arith.constant 0 : i32
    %c0_i32_1 = arith.constant 0 : i32
    return %c0_i32, %c0_i32_0 : i32, i32
  }
  func.func @transform_5(%arg0: i32) -> (i32, i32) {
    %c0_i32 = arith.constant 0 : i32
    %c0_i32_0 = arith.constant 0 : i32
    %c0_i32_1 = arith.constant 0 : i32
    return %c0_i32, %c0_i32_0 : i32, i32
  }
  func.func @transform_6(%arg0: i32) -> (i32, i32) {
    %c0_i32 = arith.constant 0 : i32
    %c0_i32_0 = arith.constant 0 : i32
    %c0_i32_1 = arith.constant 0 : i32
    return %c0_i32, %c0_i32_0 : i32, i32
  }
  func.func @transform_7(%arg0: i32) -> (i32, i32) {
    %c0_i32 = arith.constant 0 : i32
    %c0_i32_0 = arith.constant 0 : i32
    return %arg0, %c0_i32 : i32, i32
  }
}

module attributes {stable_mosaic.version = 11 : i64} {
  func.func @_actor_kernel(%arg0: i32, %arg1: memref<16x16xf32, #tpu.memory_space<vmem>>, %arg2: memref<16x512xbf16, #tpu.memory_space<vmem>>, %arg3: memref<1x512xf32, #tpu.memory_space<vmem>>, %arg4: memref<512x384xbf16, #tpu.memory_space<vmem>>, %arg5: memref<1x384xf32, #tpu.memory_space<vmem>>, %arg6: memref<384x4xbf16, #tpu.memory_space<vmem>>, %arg7: memref<1x4xf32, #tpu.memory_space<vmem>>, %arg8: memref<16x4xf32, #tpu.memory_space<vmem>>) attributes {dimension_semantics = [#tpu.dimension_semantics<parallel>], iteration_bounds = array<i64: 1>, scalar_prefetch = 0 : i64, scratch_operands = 0 : i64, tpu.core_type = #tpu.core_type<tc>, window_params = [{transform_indices = @transform_0, window_bounds = array<i64: 16, 16>}, {pipeline_mode = #tpu.pipeline_mode<synchronous>, transform_indices = @transform_1, window_bounds = array<i64: 16, 512>}, {pipeline_mode = #tpu.pipeline_mode<synchronous>, transform_indices = @transform_2, window_bounds = array<i64: 1, 512>}, {pipeline_mode = #tpu.pipeline_mode<synchronous>, transform_indices = @transform_3, window_bounds = array<i64: 512, 384>}, {pipeline_mode = #tpu.pipeline_mode<synchronous>, transform_indices = @transform_4, window_bounds = array<i64: 1, 384>}, {pipeline_mode = #tpu.pipeline_mode<synchronous>, transform_indices = @transform_5, window_bounds = array<i64: 384, 4>}, {pipeline_mode = #tpu.pipeline_mode<synchronous>, transform_indices = @transform_6, window_bounds = array<i64: 1, 4>}, {transform_indices = @transform_7, window_bounds = array<i64: 16, 4>}]} {
    %c0 = arith.constant 0 : index
    %c0_0 = arith.constant 0 : index
    %0 = vector.load %arg1[%c0, %c0_0] : memref<16x16xf32, #tpu.memory_space<vmem>>, vector<16x16xf32>
    %1 = arith.truncf %0 : vector<16x16xf32> to vector<16x16xbf16>
    %c0_1 = arith.constant 0 : index
    %c0_2 = arith.constant 0 : index
    %2 = vector.load %arg2[%c0_1, %c0_2] : memref<16x512xbf16, #tpu.memory_space<vmem>>, vector<16x512xbf16>
    %cst = arith.constant dense<0.000000e+00> : vector<16x512xf32>
    %3 = tpu.matmul %1, %2, %cst {dimension_numbers = #tpu.dot_dimension_numbers<[1], [0], [0], [1], [0, 0, 1, 1], [], []>} : vector<16x16xbf16>, vector<16x512xbf16>, vector<16x512xf32> -> vector<16x512xf32>
    %c0_3 = arith.constant 0 : index
    %c0_4 = arith.constant 0 : index
    %4 = vector.load %arg3[%c0_3, %c0_4] : memref<1x512xf32, #tpu.memory_space<vmem>>, vector<1x512xf32>
    %5 = vector.broadcast %4 : vector<1x512xf32> to vector<16x512xf32>
    %6 = arith.addf %3, %5 : vector<16x512xf32>
    %cst_5 = arith.constant 0.000000e+00 : f32
    %7 = vector.broadcast %cst_5 : f32 to vector<16x512xf32>
    %8 = arith.maximumf %6, %7 : vector<16x512xf32>
    %9 = arith.truncf %8 : vector<16x512xf32> to vector<16x512xbf16>
    %c0_6 = arith.constant 0 : index
    %c0_7 = arith.constant 0 : index
    %10 = vector.load %arg4[%c0_6, %c0_7] : memref<512x384xbf16, #tpu.memory_space<vmem>>, vector<512x384xbf16>
    %cst_8 = arith.constant dense<0.000000e+00> : vector<16x384xf32>
    %11 = tpu.matmul %9, %10, %cst_8 {dimension_numbers = #tpu.dot_dimension_numbers<[1], [0], [0], [1], [0, 0, 1, 1], [], []>} : vector<16x512xbf16>, vector<512x384xbf16>, vector<16x384xf32> -> vector<16x384xf32>
    %c0_9 = arith.constant 0 : index
    %c0_10 = arith.constant 0 : index
    %12 = vector.load %arg5[%c0_9, %c0_10] : memref<1x384xf32, #tpu.memory_space<vmem>>, vector<1x384xf32>
    %13 = vector.broadcast %12 : vector<1x384xf32> to vector<16x384xf32>
    %14 = arith.addf %11, %13 : vector<16x384xf32>
    %cst_11 = arith.constant 0.000000e+00 : f32
    %15 = vector.broadcast %cst_11 : f32 to vector<16x384xf32>
    %16 = arith.maximumf %14, %15 : vector<16x384xf32>
    %17 = arith.truncf %16 : vector<16x384xf32> to vector<16x384xbf16>
    %c0_12 = arith.constant 0 : index
    %c0_13 = arith.constant 0 : index
    %18 = vector.load %arg6[%c0_12, %c0_13] : memref<384x4xbf16, #tpu.memory_space<vmem>>, vector<384x4xbf16>
    %cst_14 = arith.constant dense<0.000000e+00> : vector<16x4xf32>
    %19 = tpu.matmul %17, %18, %cst_14 {dimension_numbers = #tpu.dot_dimension_numbers<[1], [0], [0], [1], [0, 0, 1, 1], [], []>} : vector<16x384xbf16>, vector<384x4xbf16>, vector<16x4xf32> -> vector<16x4xf32>
    %c0_15 = arith.constant 0 : index
    %c0_16 = arith.constant 0 : index
    %20 = vector.load %arg7[%c0_15, %c0_16] : memref<1x4xf32, #tpu.memory_space<vmem>>, vector<1x4xf32>
    %21 = vector.broadcast %20 : vector<1x4xf32> to vector<16x4xf32>
    %22 = arith.addf %19, %21 : vector<16x4xf32>
    %23 = math.tanh %22 : vector<16x4xf32>
    %cst_17 = arith.constant 2.000000e+00 : f32
    %24 = vector.broadcast %cst_17 : f32 to vector<16x4xf32>
    %25 = arith.mulf %23, %24 : vector<16x4xf32>
    %c0_18 = arith.constant 0 : index
    %c0_19 = arith.constant 0 : index
    %26 = vector.load %arg8[%c0_18, %c0_19] : memref<16x4xf32, #tpu.memory_space<vmem>>, vector<16x4xf32>
    tpu.vector_store %arg8[%c0_18, %c0_19], %25 {strides = array<i32>} : memref<16x4xf32, #tpu.memory_space<vmem>>, vector<16x4xf32>,
    return
  }
  func.func @transform_0(%arg0: i32) -> (i32, i32) {
    %c0_i32 = arith.constant 0 : i32
    %c0_i32_0 = arith.constant 0 : i32
    return %arg0, %c0_i32 : i32, i32
  }
  func.func @transform_1(%arg0: i32) -> (i32, i32) {
    %c0_i32 = arith.constant 0 : i32
    %c0_i32_0 = arith.constant 0 : i32
    %c0_i32_1 = arith.constant 0 : i32
    return %c0_i32, %c0_i32_0 : i32, i32
  }
  func.func @transform_2(%arg0: i32) -> (i32, i32) {
    %c0_i32 = arith.constant 0 : i32
    %c0_i32_0 = arith.constant 0 : i32
    %c0_i32_1 = arith.constant 0 : i32
    return %c0_i32, %c0_i32_0 : i32, i32
  }
  func.func @transform_3(%arg0: i32) -> (i32, i32) {
    %c0_i32 = arith.constant 0 : i32
    %c0_i32_0 = arith.constant 0 : i32
    %c0_i32_1 = arith.constant 0 : i32
    return %c0_i32, %c0_i32_0 : i32, i32
  }
  func.func @transform_4(%arg0: i32) -> (i32, i32) {
    %c0_i32 = arith.constant 0 : i32
    %c0_i32_0 = arith.constant 0 : i32
    %c0_i32_1 = arith.constant 0 : i32
    return %c0_i32, %c0_i32_0 : i32, i32
  }
  func.func @transform_5(%arg0: i32) -> (i32, i32) {
    %c0_i32 = arith.constant 0 : i32
    %c0_i32_0 = arith.constant 0 : i32
    %c0_i32_1 = arith.constant 0 : i32
    return %c0_i32, %c0_i32_0 : i32, i32
  }
  func.func @transform_6(%arg0: i32) -> (i32, i32) {
    %c0_i32 = arith.constant 0 : i32
    %c0_i32_0 = arith.constant 0 : i32
    %c0_i32_1 = arith.constant 0 : i32
    return %c0_i32, %c0_i32_0 : i32, i32
  }
  func.func @transform_7(%arg0: i32) -> (i32, i32) {
    %c0_i32 = arith.constant 0 : i32
    %c0_i32_0 = arith.constant 0 : i32
    return %arg0, %c0_i32 : i32, i32
  }
}

</mosaic_0001>

<bundles_post_ra>
// kernel: tpu_custom_call.1
= control target key start
LH: loop header
LB: loop body
LE: loop exit
PB: predicated region body
PF: predicated region fallthrough
CT: control target
= control target key end

     0   :  { %12 = vsyncpa [#allocation3], 0  ;;  %s1949_s0 = inlined_call_operand.vmem [shape: f32[2,16], index: 0, kind: input, shape index: {}]   ;;  %s1950_s1 = inlined_call_operand.vmem [shape: bf16[16,512], index: 1, kind: input, shape index: {}]   ;;  %s1951_s2 = inlined_call_operand.vmem [shape: f32[1,512], index: 2, kind: input, shape index: {}]   ;;  %s1952_s3 = inlined_call_operand.hbm [shape: bf16[512,384], index: 3, kind: input, shape index: {}]   ;;  %s1953_s4 = inlined_call_operand.vmem [shape: f32[1,384], index: 4, kind: input, shape index: {}]   ;;  %s1954_s5 = inlined_call_operand.vmem [shape: bf16[384,4], index: 5, kind: input, shape index: {}]   ;;  %s1955_s6 = inlined_call_operand.vmem [shape: f32[1,4], index: 6, kind: input, shape index: {}]   ;;  %s1956_s7 = inlined_call_operand.hbm [shape: f32[2,4], index: 7, kind: output, shape index: {}]  }
   0x1   :  { %13 = vsyncpa [#allocation4], 0  ;;  %s1769_s24 = smov [#allocation2]  }
   0x2   :  { %s25_s25 = sshll.u32 %s1769_s24, 4  ;;  %s26_s25 = int_to_ptr.vmem [resolvable:$true] %s25_s25 }
   0x3   :  { %s1733_s26 = scalar_lea.vmem %s26_s25, 12288  ;;  %p1738_p1 = scmp.lt.s32.totalorder %s26_s25, %s26_s25 }
   0x4   :  { %p1734_p0 = scmp.ne.s32.totalorder %s26_s25, %s1733_s26  ;;  %p1739_p2 = scmp.lt.s32.totalorder %s1733_s26, %s1733_s26 }
   0x6   :  { %p1740_p3 = por %p1739_p2, %p1738_p1 }
   0x8   :  { %p1741_p4 = pnand %p1740_p3, %p1734_p0 }
   0xa   :  { %1744 = shalt.err (!%p1741_p4)
}
   0xb   :  { %s1770_s27 = smov 192   ;;  %s1771_s28 = smov 12  }
   0xc   :  { %31 = dma.hbm_to_vmem [thread:$0]  %s1952_s3, 12288, %s26_s25, [#allocation3], %s1770_s27, %s1770_s27, %s1771_s28  }
   0xd   :  { %1765 = dma.done.wait [#allocation3], 12288  }
   0xe   :  { %1766 = vsyncadd [#allocation3], 4294955008  ;;  %v1772_v0 = vmov 0   ;;  %v1563_v1 = vld [vmem:[%s1950_s1 + $0x4] ss:$16 sps:$4 sm:$0xff]   ;;  %v43_v6 = vld [vmem:[%s1949_s0 + $0x8] sm:$0xff] }
   0xf   :  { %127 = vmatprep.mubr.bf16.mxu0 %v1772_v0  ;;  %170 = vmatprep.mubr.bf16.mxu1 %v1772_v0  ;;  %v1565_v2 = vld [vmem:[%s1950_s1 + $0xc] ss:$16 sps:$4 sm:$0xff]   ;;  %v1567_v3 = vld [vmem:[%s1950_s1] ss:$16 sps:$4 sm:$0xff]   ;;  %v1568_v4 = vld [vmem:[%s1950_s1 + $0x8] ss:$16 sps:$4 sm:$0xff]  }
  0x10   :  { %109 = vmatprep.subr.bf16.mxu0 %v1563_v1  ;;  %v42_v5 = vld [vmem:[%s1949_s0] sm:$0xff]  ;;  %152 = vmatprep.subr.bf16.mxu1 %v1565_v2  ;;  %vm91_vm0 = vcmask 130048   ;;  %v1569_v8 = vld [vmem:[#allocation2 + $0xa8] ss:$12 sps:$4 sm:$0xff]   ;;  %v1571_v9 = vld [vmem:[#allocation2 + $0xac] ss:$12 sps:$4 sm:$0xff]  }
  0x11   :  { %110 = vmatpush1.bf16.msra.mxu0 %v1567_v3  ;;  %153 = vmatpush1.bf16.msra.mxu1 %v1568_v4  ;;  %v44_v7 = vpack.c.bf16 %v43_v6, %v42_v5  ;;  %v1572_v10 = vld [vmem:[#allocation2 + $0x228] ss:$12 sps:$4 sm:$0xff]   ;;  %v1574_v11 = vld [vmem:[#allocation2 + $0x22c] ss:$12 sps:$4 sm:$0xff]   ;;  %v1575_v13 = vld [vmem:[#allocation2 + $0x90] ss:$12 sps:$4 sm:$0xff]  }
  0x12   :  { %850 = vmatprep.subr.bf16.mxu0 %v1571_v9  ;;  %v1577_v12 = vld [vmem:[#allocation2 + $0x94] ss:$12 sps:$4 sm:$0xff]   ;;  %893 = vmatprep.subr.bf16.mxu1 %v1574_v11  ;;  %v1578_v15 = vld [vmem:[#allocation2 + $0x210] ss:$12 sps:$4 sm:$0xff]   ;;  %v1581_v18 = vld [vmem:[#allocation2 + $0x78] ss:$12 sps:$4 sm:$0xff]  }
  0x13   :  { %v1580_v14 = vld [vmem:[#allocation2 + $0x214] ss:$12 sps:$4 sm:$0xff]   ;;  %v1583_v16 = vld [vmem:[#allocation2 + $0x7c] ss:$12 sps:$4 sm:$0xff]   ;;  %v1584_v19 = vld [vmem:[#allocation2 + $0x1f8] ss:$12 sps:$4 sm:$0xff]  }
  0x14   :  { %1336 = vmatmul.mubr.msk.bf16.vlgmr.msra.gmra.mxu0 %vm91_vm0, %v44_v7  ;;  %1337 = vmatmul.mubr.msk.bf16.vlgmr.msra.gmra.mxu1 %vm91_vm0, %v44_v7  ;;  %v1586_v17 = vld [vmem:[#allocation2 + $0x1fc] ss:$12 sps:$4 sm:$0xff]   ;;  %v1589_v20 = vld [vmem:[#allocation2 + $0x64] ss:$12 sps:$4 sm:$0xff]   ;;  %v1587_v22 = vld [vmem:[#allocation2 + $0x60] ss:$12 sps:$4 sm:$0xff]  }
  0x15   :  { %851 = vmatpush1.bf16.msra.mxu0 %v1569_v8  ;;  %894 = vmatpush1.bf16.msra.mxu1 %v1572_v10  ;;  %v1592_v21 = vld [vmem:[#allocation2 + $0x1e4] ss:$12 sps:$4 sm:$0xff]   ;;  %v1590_v23 = vld [vmem:[#allocation2 + $0x1e0] ss:$12 sps:$4 sm:$0xff]   ;;  %v1593_v26 = vld [vmem:[#allocation2 + $0x48] ss:$12 sps:$4 sm:$0xff]   ;;  %v51_v10 = vlaneseq }
  0x16   :  { %852 = vmatprep.subr.bf16.mxu0 %v1577_v12  ;;  %895 = vmatprep.subr.bf16.mxu1 %v1580_v14  ;;  %v1595_v24 = vld [vmem:[#allocation2 + $0x4c] ss:$12 sps:$4 sm:$0xff]   ;;  %v1596_v27 = vld [vmem:[#allocation2 + $0x1c8] ss:$12 sps:$4 sm:$0xff]   ;;  %v1599_v30 = vld [vmem:[#allocation2 + $0x30] ss:$12 sps:$4 sm:$0xff]  }
  0x17   :  { %v1598_v25 = vld [vmem:[#allocation2 + $0x1cc] ss:$12 sps:$4 sm:$0xff]   ;;  %v1601_v28 = vld [vmem:[#allocation2 + $0x34] ss:$12 sps:$4 sm:$0xff]   ;;  %v1602_v31 = vld [vmem:[#allocation2 + $0x1b0] ss:$12 sps:$4 sm:$0xff]  }
  0x18   :  { %v1604_v29 = vld [vmem:[#allocation2 + $0x1b4] ss:$12 sps:$4 sm:$0xff]   ;;  %v1607_v32 = vld [vmem:[#allocation2 + $0x1c] ss:$12 sps:$4 sm:$0xff]   ;;  %v1605_v34 = vld [vmem:[#allocation2 + $0x18] ss:$12 sps:$4 sm:$0xff]  }
  0x19   :  { %853 = vmatpush1.bf16.msra.mxu0 %v1575_v13  ;;  %896 = vmatpush1.bf16.msra.mxu1 %v1578_v15  ;;  %v1610_v33 = vld [vmem:[#allocation2 + $0x19c] ss:$12 sps:$4 sm:$0xff]   ;;  %v1608_v35 = vld [vmem:[#allocation2 + $0x198] ss:$12 sps:$4 sm:$0xff]   ;;  %v1611_v38 = vld [vmem:[#allocation2] ss:$12 sps:$4 sm:$0xff]  }
  0x1a   :  { %854 = vmatprep.subr.bf16.mxu0 %v1583_v16  ;;  %897 = vmatprep.subr.bf16.mxu1 %v1586_v17  ;;  %v1613_v36 = vld [vmem:[#allocation2 + $0x4] ss:$12 sps:$4 sm:$0xff]   ;;  %v1614_v39 = vld [vmem:[#allocation2 + $0x180] ss:$12 sps:$4 sm:$0xff]   ;;  %v1617_v42 = vld [vmem:[#allocation2 + $0x168] ss:$12 sps:$4 sm:$0xff]  }
  0x1b   :  { %v1616_v37 = vld [vmem:[#allocation2 + $0x184] ss:$12 sps:$4 sm:$0xff]   ;;  %v1619_v40 = vld [vmem:[#allocation2 + $0x16c] ss:$12 sps:$4 sm:$0xff]   ;;  %v1620_v43 = vld [vmem:[#allocation2 + $0x2e8] ss:$12 sps:$4 sm:$0xff]  }
  0x1c   :  { %v1622_v41 = vld [vmem:[#allocation2 + $0x2ec] ss:$12 sps:$4 sm:$0xff]   ;;  %v1625_v44 = vld [vmem:[#allocation2 + $0x154] ss:$12 sps:$4 sm:$0xff]   ;;  %v1623_v45 = vld [vmem:[#allocation2 + $0x150] ss:$12 sps:$4 sm:$0xff]  }
  0x1d   :  { %855 = vmatpush1.bf16.msra.mxu0 %v1581_v18  ;;  %898 = vmatpush1.bf16.msra.mxu1 %v1584_v19  ;;  %v1628_v46 = vld [vmem:[#allocation2 + $0x2d4] ss:$12 sps:$4 sm:$0xff]   ;;  %v1626_v47 = vld [vmem:[#allocation2 + $0x2d0] ss:$12 sps:$4 sm:$0xff]   ;;  %v1629_v50 = vld [vmem:[#allocation2 + $0x138] ss:$12 sps:$4 sm:$0xff]  }
  0x1e   :  { %856 = vmatprep.subr.bf16.mxu0 %v1589_v20  ;;  %899 = vmatprep.subr.bf16.mxu1 %v1592_v21  ;;  %v1631_v48 = vld [vmem:[#allocation2 + $0x13c] ss:$12 sps:$4 sm:$0xff]   ;;  %v1632_v51 = vld [vmem:[#allocation2 + $0x2b8] ss:$12 sps:$4 sm:$0xff]   ;;  %v1635_v54 = vld [vmem:[#allocation2 + $0x120] ss:$12 sps:$4 sm:$0xff]  }
  0x1f   :  { %v1634_v49 = vld [vmem:[#allocation2 + $0x2bc] ss:$12 sps:$4 sm:$0xff]   ;;  %v1637_v52 = vld [vmem:[#allocation2 + $0x124] ss:$12 sps:$4 sm:$0xff]   ;;  %v1638_v55 = vld [vmem:[#allocation2 + $0x2a0] ss:$12 sps:$4 sm:$0xff]  }
  0x20   :  { %v1640_v53 = vld [vmem:[#allocation2 + $0x2a4] ss:$12 sps:$4 sm:$0xff]   ;;  %v1643_v56 = vld [vmem:[#allocation2 + $0x10c] ss:$12 sps:$4 sm:$0xff]   ;;  %v1641_v58 = vld [vmem:[#allocation2 + $0x108] ss:$12 sps:$4 sm:$0xff]  }
  0x21   :  { %857 = vmatpush1.bf16.msra.mxu0 %v1587_v22  ;;  %900 = vmatpush1.bf16.msra.mxu1 %v1590_v23  ;;  %v1646_v57 = vld [vmem:[#allocation2 + $0x28c] ss:$12 sps:$4 sm:$0xff]   ;;  %v1644_v59 = vld [vmem:[#allocation2 + $0x288] ss:$12 sps:$4 sm:$0xff]   ;;  %v1647_v62 = vld [vmem:[#allocation2 + $0xf0] ss:$12 sps:$4 sm:$0xff]  }
  0x22   :  { %858 = vmatprep.subr.bf16.mxu0 %v1595_v24  ;;  %901 = vmatprep.subr.bf16.mxu1 %v1598_v25  ;;  %v1649_v60 = vld [vmem:[#allocation2 + $0xf4] ss:$12 sps:$4 sm:$0xff]   ;;  %v1650_v63 = vld [vmem:[#allocation2 + $0x270] ss:$12 sps:$4 sm:$0xff]   ;;  %v1653_v2 = vld [vmem:[#allocation2 + $0xd8] ss:$12 sps:$4 sm:$0xff]  }
  0x23   :  { %v1652_v61 = vld [vmem:[#allocation2 + $0x274] ss:$12 sps:$4 sm:$0xff]   ;;  %v1655_v0 = vld [vmem:[#allocation2 + $0xdc] ss:$12 sps:$4 sm:$0xff]   ;;  %v1656_v3 = vld [vmem:[#allocation2 + $0x258] ss:$12 sps:$4 sm:$0xff]  }
  0x24   :  { %v1658_v1 = vld [vmem:[#allocation2 + $0x25c] ss:$12 sps:$4 sm:$0xff]   ;;  %v1661_v4 = vld [vmem:[#allocation2 + $0xc4] ss:$12 sps:$4 sm:$0xff]   ;;  %v1659_v6 = vld [vmem:[#allocation2 + $0xc0] ss:$12 sps:$4 sm:$0xff]  }
  0x25   :  { %859 = vmatpush1.bf16.msra.mxu0 %v1593_v26  ;;  %902 = vmatpush1.bf16.msra.mxu1 %v1596_v27  ;;  %v1664_v5 = vld [vmem:[#allocation2 + $0x244] ss:$12 sps:$4 sm:$0xff]   ;;  %v1662_v7 = vld [vmem:[#allocation2 + $0x240] ss:$12 sps:$4 sm:$0xff]   ;;  %v1839_v11 = vshrl.u32 %v51_v10, 7  ;;  %vm1774_vm1 = vmmov 0  }
  0x26   :  { %860 = vmatprep.subr.bf16.mxu0 %v1601_v28  ;;  %903 = vmatprep.subr.bf16.mxu1 %v1604_v29  ;;  %v1665_v8 = vld [vmem:[#allocation2 + $0x170] ss:$12 sps:$4 sm:$0xff]   ;;  %v49_v16 = vld [vmem:[%s1951_s2] sm:$0xf]  ;;  %vm1312_vm2 = vcmask 31744  }
  0x27   :  { %v1666_v9 = vld [vmem:[#allocation2 + $0x2f0] ss:$12 sps:$4 sm:$0xff]   ;;  %v57_v12 = vsub.s32 1, %v1839_v11  ;;  %v65_v13 = vsub.s32 3, %v1839_v11  ;;  %v53_v14 = vsub.s32 0, %v1839_v11  ;;  %v61_v15 = vsub.s32 2, %v1839_v11 }
  0x28   :  { %v1692_v10 = vld [vmem:[#allocation2 + $0x1a0] ss:$12 sps:$4 sm:$0xff]  }
  0x29   :  { %861 = vmatpush1.bf16.msra.mxu0 %v1599_v30  ;;  %904 = vmatpush1.bf16.msra.mxu1 %v1602_v31  ;;  %v58_v19 = vrot.slane %v49_v16, %v57_v12  ;;  %v66_v20 = vrot.slane %v49_v16, %v65_v13  ;;  %v54_v21 = vrot.slane %v49_v16, %v53_v14  ;;  %v1693_v13 = vld [vmem:[#allocation2 + $0xc8] ss:$12 sps:$4 sm:$0xff]  }
  0x2a   :  { %862 = vmatprep.subr.bf16.mxu0 %v1607_v32  ;;  %905 = vmatprep.subr.bf16.mxu1 %v1610_v33  ;;  %v62_v22 = vrot.slane %v49_v16, %v61_v15  ;;  %v1694_v16 = vld [vmem:[#allocation2 + $0x248] ss:$12 sps:$4 sm:$0xff]  }
  0x2d   :  { %863 = vmatpush1.bf16.msra.mxu0 %v1605_v34  ;;  %906 = vmatpush1.bf16.msra.mxu1 %v1608_v35 }
  0x2e   :  { %864 = vmatprep.subr.bf16.mxu0 %v1613_v36  ;;  %907 = vmatprep.subr.bf16.mxu1 %v1616_v37 }
  0x31   :  { %865 = vmatpush1.bf16.msra.mxu0 %v1611_v38  ;;  %908 = vmatpush1.bf16.msra.mxu1 %v1614_v39 }
  0x32   :  { %866 = vmatprep.subr.bf16.mxu0 %v1619_v40  ;;  %909 = vmatprep.subr.bf16.mxu1 %v1622_v41 }
  0x35   :  { %867 = vmatpush2.bf16.msra.mxu0 %v1617_v42  ;;  %910 = vmatpush2.bf16.msra.mxu1 %v1620_v43 }
  0x36   :  { %868 = vmatprep.subr.bf16.mxu0 %v1625_v44  ;;  %911 = vmatprep.subr.bf16.mxu1 %v1628_v46 }
  0x39   :  { %869 = vmatpush2.bf16.msra.mxu0 %v1623_v45  ;;  %912 = vmatpush2.bf16.msra.mxu1 %v1626_v47  ;;  %v1667_v47 = vld [vmem:[#allocation2 + $0xb0] ss:$12 sps:$4 sm:$0xff]  }
  0x3a   :  { %870 = vmatprep.subr.bf16.mxu0 %v1631_v48  ;;  %913 = vmatprep.subr.bf16.mxu1 %v1634_v49  ;;  %v1668_v48 = vld [vmem:[#allocation2 + $0x230] ss:$12 sps:$4 sm:$0xff]  }
  0x3d   :  { %871 = vmatpush2.bf16.msra.mxu0 %v1629_v50  ;;  %914 = vmatpush2.bf16.msra.mxu1 %v1632_v51  ;;  %v1669_v51 = vld [vmem:[#allocation2 + $0x158] ss:$12 sps:$4 sm:$0xff]  }
  0x3e   :  { %872 = vmatprep.subr.bf16.mxu0 %v1637_v52  ;;  %915 = vmatprep.subr.bf16.mxu1 %v1640_v53  ;;  %v1670_v52 = vld [vmem:[#allocation2 + $0x2d8] ss:$12 sps:$4 sm:$0xff]  }
  0x3f   :  { %v1671_v53 = vld [vmem:[#allocation2 + $0x98] ss:$12 sps:$4 sm:$0xff]  }
  0x41   :  { %873 = vmatpush2.bf16.msra.mxu0 %v1635_v54  ;;  %916 = vmatpush2.bf16.msra.mxu1 %v1638_v55  ;;  %v1672_v54 = vld [vmem:[#allocation2 + $0x218] ss:$12 sps:$4 sm:$0xff]   ;;  %v1673_v55 = vld [vmem:[#allocation2 + $0x140] ss:$12 sps:$4 sm:$0xff]  }
  0x42   :  { %874 = vmatprep.subr.bf16.mxu0 %v1643_v56  ;;  %917 = vmatprep.subr.bf16.mxu1 %v1646_v57  ;;  %v1674_v56 = vld [vmem:[#allocation2 + $0x2c0] ss:$12 sps:$4 sm:$0xff]  }
  0x43   :  { %v1675_v57 = vld [vmem:[#allocation2 + $0x80] ss:$12 sps:$4 sm:$0xff]  }
  0x45   :  { %875 = vmatpush2.bf16.msra.mxu0 %v1641_v58  ;;  %918 = vmatpush2.bf16.msra.mxu1 %v1644_v59  ;;  %v1676_v58 = vld [vmem:[#allocation2 + $0x200] ss:$12 sps:$4 sm:$0xff]   ;;  %v1677_v59 = vld [vmem:[#allocation2 + $0x128] ss:$12 sps:$4 sm:$0xff]  }
  0x46   :  { %876 = vmatprep.subr.bf16.mxu0 %v1649_v60  ;;  %919 = vmatprep.subr.bf16.mxu1 %v1652_v61  ;;  %v1678_v60 = vld [vmem:[#allocation2 + $0x2a8] ss:$12 sps:$4 sm:$0xff]  }
  0x47   :  { %v1679_v61 = vld [vmem:[#allocation2 + $0x68] ss:$12 sps:$4 sm:$0xff]  }
  0x49   :  { %877 = vmatpush2.bf16.msra.mxu0 %v1647_v62  ;;  %920 = vmatpush2.bf16.msra.mxu1 %v1650_v63  ;;  %v1680_v62 = vld [vmem:[#allocation2 + $0x1e8] ss:$12 sps:$4 sm:$0xff]   ;;  %v1681_v63 = vld [vmem:[#allocation2 + $0x110] ss:$12 sps:$4 sm:$0xff]  }
  0x4a   :  { %878 = vmatprep.subr.bf16.mxu0 %v1655_v0  ;;  %921 = vmatprep.subr.bf16.mxu1 %v1658_v1  ;;  %v1682_v0 = vld [vmem:[#allocation2 + $0x290] ss:$12 sps:$4 sm:$0xff]  }
  0x4b   :  { %v1683_v1 = vld [vmem:[#allocation2 + $0x50] ss:$12 sps:$4 sm:$0xff]  }
  0x4d   :  { %879 = vmatpush2.bf16.msra.mxu0 %v1653_v2  ;;  %922 = vmatpush2.bf16.msra.mxu1 %v1656_v3  ;;  %v1684_v2 = vld [vmem:[#allocation2 + $0x1d0] ss:$12 sps:$4 sm:$0xff]   ;;  %v1685_v3 = vld [vmem:[#allocation2 + $0xf8] ss:$12 sps:$4 sm:$0xff]  }
  0x4e   :  { %880 = vmatprep.subr.bf16.mxu0 %v1661_v4  ;;  %923 = vmatprep.subr.bf16.mxu1 %v1664_v5  ;;  %v1686_v4 = vld [vmem:[#allocation2 + $0x278] ss:$12 sps:$4 sm:$0xff]  }
  0x4f   :  { %v1687_v5 = vld [vmem:[#allocation2 + $0x38] ss:$12 sps:$4 sm:$0xff]  }
  0x51   :  { %881 = vmatpush2.bf16.msra.mxu0 %v1659_v6  ;;  %924 = vmatpush2.bf16.msra.mxu1 %v1662_v7  ;;  %v1688_v6 = vld [vmem:[#allocation2 + $0x1b8] ss:$12 sps:$4 sm:$0xff]   ;;  %v1689_v7 = vld [vmem:[#allocation2 + $0xe0] ss:$12 sps:$4 sm:$0xff]  }
  0x52   :  { %1459 = vmatprep.subr.bf16.mxu0 %v1665_v8  ;;  %1481 = vmatprep.subr.bf16.mxu1 %v1666_v9  ;;  %v1690_v8 = vld [vmem:[#allocation2 + $0x260] ss:$12 sps:$4 sm:$0xff]  }
  0x53   :  { %v1691_v9 = vld [vmem:[#allocation2 + $0x20] ss:$12 sps:$4 sm:$0xff]  }
  0xd4   :  { %v129_v17 = vpop.f32.mrf.mxu0  ;;  %v172_v18 = vpop.f32.mrf.mxu1 }
  0xd5   :  { %v130_v31 = vadd.f32 %v129_v17, %v54_v21  ;;  %v173_v32 = vadd.f32 %v172_v18, %v62_v22  ;;  %v1695_v17 = vld [vmem:[#allocation2 + $0x8] ss:$12 sps:$4 sm:$0xff]  }
  0xd6   :  { %v131_v23 = vpop.f32.mrf.mxu0  ;;  %v174_v24 = vpop.f32.mrf.mxu1  ;;  %v1696_v18 = vld [vmem:[#allocation2 + $0x188] ss:$12 sps:$4 sm:$0xff]  }
  0xd7   :  { %v132_v27 = vadd.f32 %v131_v23, %v58_v19  ;;  %v175_v28 = vadd.f32 %v174_v24, %v66_v20  ;;  %v181_v43 = vmax.f32 %v130_v31, 0.0  ;;  %v183_v44 = vmax.f32 %v173_v32, 0.0  ;;  %v1701_v23 = vld [vmem:[%s1954_s5 + $0x68] sm:$0xff]  }
  0xd8   :  { %v133_v25 = vpop.f32.mrf.mxu0  ;;  %v176_v26 = vpop.f32.mrf.mxu1  ;;  %v1702_v24 = vld [vmem:[%s1954_s5 + $0x28] sm:$0xff]  }
  0xd9   :  { %v134_v29 = vadd.f32 %v133_v25, %v54_v21  ;;  %v177_v30 = vadd.f32 %v176_v26, %v62_v22  ;;  %v182_v39 = vmax.f32 %v132_v27, 0.0  ;;  %v184_v40 = vmax.f32 %v175_v28, 0.0  ;;  %v1699_v21 = vld [vmem:[%s1954_s5 + $0x70] sm:$0xff]   ;;  %v1703_v25 = vld [vmem:[%s1954_s5 + $0x60] sm:$0xff]   ;;  %v1705_v27 = vld [vmem:[%s1954_s5 + $0x58] sm:$0xff]  }
  0xda   :  { %v135_v33 = vpop.f32.mrf.mxu0  ;;  %v178_v34 = vpop.f32.mrf.mxu1  ;;  %v1700_v22 = vld [vmem:[%s1954_s5 + $0x30] sm:$0xff]   ;;  %v1704_v26 = vld [vmem:[%s1954_s5 + $0x20] sm:$0xff]   ;;  %v1706_v28 = vld [vmem:[%s1954_s5 + $0x18] sm:$0xff]  }
  0xdb   :  { %v136_v35 = vadd.f32 %v135_v33, %v58_v19  ;;  %v179_v36 = vadd.f32 %v178_v34, %v66_v20  ;;  %v185_v37 = vmax.f32 %v134_v29, 0.0  ;;  %v187_v38 = vmax.f32 %v177_v30, 0.0  ;;  %v1697_v19 = vld [vmem:[%s1954_s5 + $0x78] sm:$0xff]   ;;  %v1707_v29 = vld [vmem:[%s1954_s5 + $0x50] sm:$0xff]   ;;  %v1709_v31 = vld [vmem:[%s1954_s5 + $0x48] sm:$0xff]  }
  0xdc   :  { %v1698_v20 = vld [vmem:[%s1954_s5 + $0x38] sm:$0xff]   ;;  %v1708_v30 = vld [vmem:[%s1954_s5 + $0x10] sm:$0xff]   ;;  %v1710_v32 = vld [vmem:[%s1954_s5 + $0x8] sm:$0xff]  }
  0xdd   :  { %v186_v41 = vmax.f32 %v136_v35, 0.0  ;;  %v188_v42 = vmax.f32 %v179_v36, 0.0  ;;  %v1854_v49 = vpack.c.bf16 %v185_v37, %v181_v43  ;;  %v1856_v50 = vpack.c.bf16 %v187_v38, %v183_v44  ;;  %v1711_v33 = vld [vmem:[%s1954_s5 + $0x40] sm:$0xff]   ;;  %v1713_v35 = vld [vmem:[%s1954_s5 + $0xb8] sm:$0xff]   ;;  %v1714_v37 = vld [vmem:[%s1954_s5 + $0xb0] sm:$0xff]  }
  0xde   :  { %v1712_v34 = vld [vmem:[%s1954_s5] sm:$0xff]   ;;  %v1773_v36 = vmov 0.0   ;;  %v1715_v38 = vld [vmem:[%s1954_s5 + $0xa8] sm:$0xff]  }
  0xdf   :  { %v190_v45 = vpack.c.bf16 %v186_v41, %v182_v39  ;;  %v192_v46 = vpack.c.bf16 %v188_v42, %v184_v40  ;;  %v1716_v39 = vld [vmem:[%s1954_s5 + $0xa0] sm:$0xff]   ;;  %v1717_v40 = vld [vmem:[%s1954_s5 + $0x98] sm:$0xff]   ;;  %v1718_v41 = vld [vmem:[%s1954_s5 + $0x90] sm:$0xff]  }
  0xe0   :  { %v1719_v42 = vld [vmem:[%s1954_s5 + $0x88] sm:$0xff]   ;;  %v1720_v43 = vld [vmem:[%s1954_s5 + $0x80] sm:$0xff]  }
  0xe1   :  { %882 = vmatprep.mubr.bf16.mxu0 %v190_v45  ;;  %925 = vmatprep.mubr.bf16.mxu1 %v192_v46  ;;  %v321_v44 = vld [vmem:[%s1953_s4] sm:$0x7] }
  0xe2   :  { %883 = vmatmul.mubr.bf16.vlgmr.msra.gmra.mxu0 %v1854_v49  ;;  %926 = vmatmul.mubr.bf16.vlgmr.msra.gmra.mxu1 %v1856_v50 }
  0xe3   :  { %1460 = vmatpush3.bf16.msra.mxu0 %v1667_v47  ;;  %1482 = vmatpush3.bf16.msra.mxu1 %v1668_v48 }
  0xe4   :  { %968 = vmatprep.mubr.bf16.mxu0 %v190_v45  ;;  %1009 = vmatprep.mubr.bf16.mxu1 %v192_v46  ;;  %v330_v45 = vrot.slane %v321_v44, %v57_v12  ;;  %v326_v46 = vrot.slane %v321_v44, %v53_v14 }
  0xe5   :  { %1461 = vmatprep.subr.bf16.mxu0 %v1669_v51  ;;  %1483 = vmatprep.subr.bf16.mxu1 %v1670_v52 }
  0xe7   :  { %1462 = vmatpush3.bf16.msra.mxu0 %v1671_v53  ;;  %1484 = vmatpush3.bf16.msra.mxu1 %v1672_v54 }
  0xe8   :  { %1463 = vmatprep.subr.bf16.mxu0 %v1673_v55  ;;  %1485 = vmatprep.subr.bf16.mxu1 %v1674_v56 }
  0xeb   :  { %1464 = vmatpush3.bf16.msra.mxu0 %v1675_v57  ;;  %1486 = vmatpush3.bf16.msra.mxu1 %v1676_v58 }
  0xec   :  { %1465 = vmatprep.subr.bf16.mxu0 %v1677_v59  ;;  %1487 = vmatprep.subr.bf16.mxu1 %v1678_v60 }
  0xef   :  { %1466 = vmatpush3.bf16.msra.mxu0 %v1679_v61  ;;  %1488 = vmatpush3.bf16.msra.mxu1 %v1680_v62 }
  0xf0   :  { %1467 = vmatprep.subr.bf16.mxu0 %v1681_v63  ;;  %1489 = vmatprep.subr.bf16.mxu1 %v1682_v0 }
  0xf3   :  { %1468 = vmatpush3.bf16.msra.mxu0 %v1683_v1  ;;  %1490 = vmatpush3.bf16.msra.mxu1 %v1684_v2 }
  0xf4   :  { %1469 = vmatprep.subr.bf16.mxu0 %v1685_v3  ;;  %1491 = vmatprep.subr.bf16.mxu1 %v1686_v4 }
  0xf7   :  { %1470 = vmatpush3.bf16.msra.mxu0 %v1687_v5  ;;  %1492 = vmatpush3.bf16.msra.mxu1 %v1688_v6  ;;  %v334_v5 = vrot.slane %v321_v44, %v61_v15 }
  0xf8   :  { %1471 = vmatprep.subr.bf16.mxu0 %v1689_v7  ;;  %1493 = vmatprep.subr.bf16.mxu1 %v1690_v8 }
  0xfb   :  { %1472 = vmatpush3.bf16.msra.mxu0 %v1691_v9  ;;  %1494 = vmatpush3.bf16.msra.mxu1 %v1692_v10 }
  0xfc   :  { %1473 = vmatprep.subr.bf16.mxu0 %v1693_v13  ;;  %1495 = vmatprep.subr.bf16.mxu1 %v1694_v16 }
  0xff   :  { %1474 = vmatpush3.bf16.msra.mxu0 %v1695_v17  ;;  %1496 = vmatpush3.bf16.msra.mxu1 %v1696_v18 }
 0x100   :  { %1503 = vmatprep.subr.bf16.mxu0 %v1697_v19  ;;  %1534 = vmatprep.subr.bf16.mxu1 %v1773_v36 }
 0x102   :  { %969 = vmatmul.mubr.bf16.vlgmr.msra.gmra.mxu0 %v1854_v49  ;;  %1010 = vmatmul.mubr.bf16.vlgmr.msra.gmra.mxu1 %v1856_v50 }
 0x103   :  { %1504 = vmatpush3.bf16.msra.mxu0 %v1698_v20  ;;  %1535 = vmatpush3.bf16.msra.mxu1 %v1713_v35 }
 0x104   :  { %1505 = vmatprep.subr.bf16.mxu0 %v1699_v21  ;;  %1536 = vmatprep.subr.bf16.mxu1 %v1773_v36 }
 0x105   :  { %1550 = vmatprep.mubr.msk.bf16.mxu1 %vm1774_vm1, %v1773_v36 }
 0x107   :  { %1506 = vmatpush3.bf16.msra.mxu0 %v1700_v22  ;;  %1537 = vmatpush3.bf16.msra.mxu1 %v1714_v37 }
 0x108   :  { %1507 = vmatprep.subr.bf16.mxu0 %v1701_v23  ;;  %1538 = vmatprep.subr.bf16.mxu1 %v1773_v36 }
 0x10b   :  { %1508 = vmatpush3.bf16.msra.mxu0 %v1702_v24  ;;  %1539 = vmatpush3.bf16.msra.mxu1 %v1715_v38 }
 0x10c   :  { %1509 = vmatprep.subr.bf16.mxu0 %v1703_v25  ;;  %1540 = vmatprep.subr.bf16.mxu1 %v1773_v36 }
 0x10f   :  { %1510 = vmatpush3.bf16.msra.mxu0 %v1704_v26  ;;  %1541 = vmatpush3.bf16.msra.mxu1 %v1716_v39 }
 0x110   :  { %1511 = vmatprep.subr.bf16.mxu0 %v1705_v27  ;;  %1542 = vmatprep.subr.bf16.mxu1 %v1773_v36 }
 0x113   :  { %1512 = vmatpush3.bf16.msra.mxu0 %v1706_v28  ;;  %1543 = vmatpush3.bf16.msra.mxu1 %v1717_v40 }
 0x114   :  { %1513 = vmatprep.subr.bf16.mxu0 %v1707_v29  ;;  %1544 = vmatprep.subr.bf16.mxu1 %v1773_v36 }
 0x117   :  { %1514 = vmatpush3.bf16.msra.mxu0 %v1708_v30  ;;  %1545 = vmatpush3.bf16.msra.mxu1 %v1718_v41  ;;  %v1434_v30 = vld [vmem:[%s1955_s6] ss:$0 sm:$0xff] }
 0x118   :  { %1515 = vmatprep.subr.bf16.mxu0 %v1709_v31  ;;  %1546 = vmatprep.subr.bf16.mxu1 %v1773_v36 }
 0x11b   :  { %1516 = vmatpush3.bf16.msra.mxu0 %v1710_v32  ;;  %1547 = vmatpush3.bf16.msra.mxu1 %v1719_v42 }
 0x11c   :  { %1517 = vmatprep.subr.bf16.mxu0 %v1711_v33  ;;  %1548 = vmatprep.subr.bf16.mxu1 %v1773_v36 }
 0x11f   :  { %1518 = vmatpush3.bf16.msra.mxu0 %v1712_v34  ;;  %1549 = vmatpush3.bf16.msra.mxu1 %v1720_v43 }
 0x1a2   :  { %v884_v47 = vpop.f32.mrf.mxu0  ;;  %v927_v48 = vpop.f32.mrf.mxu1 }
 0x1a3   :  { %v885_v52 = vadd.f32 %v884_v47, %v326_v46 }
 0x1a4   :  { %v886_v49 = vpop.f32.mrf.mxu0  ;;  %v929_v50 = vpop.f32.mrf.mxu1 }
 0x1a5   :  { %v887_v51 = vadd.f32 %v886_v49, %v330_v45  ;;  %v928_v60 = vadd.f32 %v927_v48, %v885_v52 }
 0x1a6   :  { %v888_v53 = vpop.f32.mrf.mxu0  ;;  %v931_v54 = vpop.f32.mrf.mxu1 }
 0x1a7   :  { %v889_v55 = vadd.f32 %v888_v53, %v326_v46  ;;  %v930_v57 = vadd.f32 %v929_v50, %v887_v51  ;;  %v1018_v14 = vmax.f32 %v928_v60, 0.0 }
 0x1a8   :  { %v890_v56 = vpop.f32.mrf.mxu0  ;;  %v933_v61 = vpop.f32.mrf.mxu1 }
 0x1a9   :  { %v932_v58 = vadd.f32 %v931_v54, %v889_v55  ;;  %v891_v59 = vadd.f32 %v890_v56, %v330_v45  ;;  %v1019_v63 = vmax.f32 %v930_v57, 0.0 }
 0x1ab   :  { %v934_v62 = vadd.f32 %v933_v61, %v891_v59  ;;  %v1021_v12 = vmax.f32 %v932_v58, 0.0 }
 0x1ad   :  { %v1022_v0 = vmax.f32 %v934_v62, 0.0  ;;  %v1024_v2 = vpack.c.bf16 %v1021_v12, %v1018_v14 }
 0x1af   :  { %v1025_v1 = vpack.c.bf16 %v1022_v0, %v1019_v63 }
 0x1b1   :  { %1258 = vmatprep.mubr.bf16.mxu0 %v1025_v1 }
 0x1b2   :  { %1259 = vmatmul.mubr.bf16.vlgmr.msra.gmra.mxu0 %v1024_v2 }
 0x1c2   :  { %v1475_v3 = vpop.f32.mrf.mxu0  ;;  %v1497_v4 = vpop.f32.mrf.mxu1 }
 0x1c4   :  { %v1476_v6 = vpop.f32.mrf.mxu0  ;;  %v1498_v7 = vpop.f32.mrf.mxu1 }
 0x1c5   :  { %v1477_v8 = vadd.f32 %v1476_v6, %v1475_v3  ;;  %v1499_v18 = vadd.f32 %v1498_v7, %v1497_v4 }
 0x1c6   :  { %v1478_v9 = vpop.f32.mrf.mxu0  ;;  %v1500_v10 = vpop.f32.mrf.mxu1 }
 0x1c7   :  { %v971_v13 = vadd.f32 %v1477_v8, %v334_v5 }
 0x1c8   :  { %v1479_v16 = vpop.f32.mrf.mxu0  ;;  %v1501_v17 = vpop.f32.mrf.mxu1 }
 0x1c9   :  { %v1480_v19 = vadd.f32 %v1479_v16, %v1478_v9  ;;  %v1012_v20 = vadd.f32 %v1499_v18, %v971_v13  ;;  %v1502_v22 = vadd.f32 %v1501_v17, %v1500_v10 }
 0x1cb   :  { %v974_v21 = vadd.f32 %v1480_v19, %v334_v5  ;;  %v1020_v24 = vmax.f32 %v1012_v20, 0.0 }
 0x1cd   :  { %v1015_v23 = vadd.f32 %v1502_v22, %v974_v21 }
 0x1cf   :  { %v1023_v25 = vmax.f32 %v1015_v23, 0.0 }
 0x1d1   :  { %v1026_v26 = vpack.c.bf16 %v1023_v25, %v1020_v24 }
 0x1d3   :  { %1551 = vmatmul.mubr.bf16.vlgmr.msra.gmra.mxu1 %v1026_v26 }
 0x272   :  { %v1519_v11 = vpop.f32.mrf.mxu0 }
 0x274   :  { %v1520_v15 = vpop.f32.mrf.mxu0 }
 0x275   :  { %v1521_v28 = vadd.f32 %v1520_v15, %v1519_v11 }
 0x276   :  { %v1522_v27 = vpop.f32.mrf.mxu0 }
 0x277   :  { %v1261_v32 = vadd.f32 %v1521_v28, %v1434_v30 }
 0x278   :  { %v1523_v29 = vpop.f32.mrf.mxu0 }
 0x279   :  { %v1524_v31 = vadd.f32 %v1523_v29, %v1522_v27 }
 0x27b   :  { %v1264_v36 = vadd.f32 %v1524_v31, %v1434_v30 }
 0x293   :  { %v1301_v33 = vpop.f32.mrf.mxu1 }
 0x294   :  { %v1302_v34 = vadd.f32 %v1301_v33, %v1261_v32 }
 0x295   :  { %v1552_v35 = vpop.f32.mrf.mxu1 }
 0x296   :  { %1721 = vtanh.f32 %v1302_v34 }
 0x297   :  { %v1304_v37 = vpop.f32.mrf.mxu1 }
 0x298   :  { %v1305_v38 = vadd.f32 %v1304_v37, %v1264_v36 }
 0x299   :  { %v1553_v39 = vpop.f32.mrf.mxu1 }
 0x29a   :  { %1723 = vtanh.f32 %v1305_v38 }
 0x2a3   :  { %v1722_v40 = vpop.eup %1721 }
 0x2a4   :  { %v1310_v41 = vmul.f32 2.0, %v1722_v40 }
 0x2a6   :  { %1313 = vst.msk [vmem:[#allocation5] sm:$0xff] %vm1312_vm2, %v1310_v41 }
 0x2a7   :  { %v1724_v42 = vpop.eup %1723 }
 0x2a8   :  { %v1311_v43 = vmul.f32 2.0, %v1724_v42 }
 0x2aa   :  { %1314 = vst.msk [vmem:[#allocation5 + $0x8] sm:$0xff] %vm1312_vm2, %v1311_v43 }
 0x2ab   :  { %1319 = vsyncadd [#allocation4], 224  ;;  %s1775_s6 = smov [#allocation5]  }
 0x2ac   :  { %s1320_s17 = sshll.u32 %s1775_s6, 4  ;;  %s1321_s17 = int_to_ptr.vmem [resolvable:$true] %s1320_s17 }
 0x2ad   :  { %s1745_s18 = scalar_lea.vmem %s1321_s17, 32  ;;  %s1749_s0 = scalar_lea.vmem %s1321_s17, 256 }
 0x2ae   :  { %p1746_p5 = scmp.ne.s32.totalorder %s1321_s17, %s1745_s18  ;;  %p1750_p6 = scmp.lt.s32.totalorder %s1321_s17, %s1321_s17 }
 0x2af   :  { %p1751_p7 = scmp.lt.s32.totalorder %s1749_s0, %s1745_s18 }
 0x2b1   :  { %p1752_p8 = por %p1751_p7, %p1750_p6 }
 0x2b3   :  { %p1753_p9 = pnand %p1752_p8, %p1746_p5 }
 0x2b5   :  { %1756 = shalt.err (!%p1753_p9)
}
 0x2b6   :  { %s1776_s1 = smov 32   ;;  %s1777_s2 = smov 2  }
 0x2b7   :  { %1326 = dma.vmem_to_hbm [thread:$0]  %s1321_s17, 32, %s1956_s7, [#allocation4], %s1776_s1, %s1776_s1, %s1777_s2  }
 0x2b8   :  { %1767 = dma.done.wait [#allocation4], 256  }
 0x2b9   :  { %1768 = vsyncadd [#allocation4], 4294967040 }
 0x2ba   :  { %1330 = vsyncpa [#allocation3], 1 }
 0x2bb   :  { %1331 = vsyncpa [#allocation4], 1 }

// kernel: tpu_custom_call.1
= control target key start
LH: loop header
LB: loop body
LE: loop exit
PB: predicated region body
PF: predicated region fallthrough
CT: control target
= control target key end

     0   :  { %12 = vsyncpa [#allocation3], 0  ;;  %s1949_s0 = inlined_call_operand.vmem [shape: f32[2,16], index: 0, kind: input, shape index: {}]   ;;  %s1950_s1 = inlined_call_operand.vmem [shape: bf16[16,512], index: 1, kind: input, shape index: {}]   ;;  %s1951_s2 = inlined_call_operand.vmem [shape: f32[1,512], index: 2, kind: input, shape index: {}]   ;;  %s1952_s3 = inlined_call_operand.hbm [shape: bf16[512,384], index: 3, kind: input, shape index: {}]   ;;  %s1953_s4 = inlined_call_operand.vmem [shape: f32[1,384], index: 4, kind: input, shape index: {}]   ;;  %s1954_s5 = inlined_call_operand.vmem [shape: bf16[384,4], index: 5, kind: input, shape index: {}]   ;;  %s1955_s6 = inlined_call_operand.vmem [shape: f32[1,4], index: 6, kind: input, shape index: {}]   ;;  %s1956_s7 = inlined_call_operand.hbm [shape: f32[2,4], index: 7, kind: output, shape index: {}]  }
   0x1   :  { %13 = vsyncpa [#allocation4], 0  ;;  %s1769_s24 = smov [#allocation2]  }
   0x2   :  { %s25_s25 = sshll.u32 %s1769_s24, 4  ;;  %s26_s25 = int_to_ptr.vmem [resolvable:$true] %s25_s25 }
   0x3   :  { %s1733_s26 = scalar_lea.vmem %s26_s25, 12288  ;;  %p1738_p1 = scmp.lt.s32.totalorder %s26_s25, %s26_s25 }
   0x4   :  { %p1734_p0 = scmp.ne.s32.totalorder %s26_s25, %s1733_s26  ;;  %p1739_p2 = scmp.lt.s32.totalorder %s1733_s26, %s1733_s26 }
   0x6   :  { %p1740_p3 = por %p1739_p2, %p1738_p1 }
   0x8   :  { %p1741_p4 = pnand %p1740_p3, %p1734_p0 }
   0xa   :  { %1744 = shalt.err (!%p1741_p4)
}
   0xb   :  { %s1770_s27 = smov 192   ;;  %s1771_s28 = smov 12  }
   0xc   :  { %31 = dma.hbm_to_vmem [thread:$0]  %s1952_s3, 12288, %s26_s25, [#allocation3], %s1770_s27, %s1770_s27, %s1771_s28  }
   0xd   :  { %1765 = dma.done.wait [#allocation3], 12288  }
   0xe   :  { %1766 = vsyncadd [#allocation3], 4294955008  ;;  %v1772_v0 = vmov 0   ;;  %v1563_v1 = vld [vmem:[%s1950_s1 + $0x4] ss:$16 sps:$4 sm:$0xff]   ;;  %v43_v6 = vld [vmem:[%s1949_s0 + $0x8] sm:$0xff] }
   0xf   :  { %127 = vmatprep.mubr.bf16.mxu0 %v1772_v0  ;;  %170 = vmatprep.mubr.bf16.mxu1 %v1772_v0  ;;  %v1565_v2 = vld [vmem:[%s1950_s1 + $0xc] ss:$16 sps:$4 sm:$0xff]   ;;  %v1567_v3 = vld [vmem:[%s1950_s1] ss:$16 sps:$4 sm:$0xff]   ;;  %v1568_v4 = vld [vmem:[%s1950_s1 + $0x8] ss:$16 sps:$4 sm:$0xff]  }
  0x10   :  { %109 = vmatprep.subr.bf16.mxu0 %v1563_v1  ;;  %v42_v5 = vld [vmem:[%s1949_s0] sm:$0xff]  ;;  %152 = vmatprep.subr.bf16.mxu1 %v1565_v2  ;;  %vm91_vm0 = vcmask 130048   ;;  %v1569_v8 = vld [vmem:[#allocation2 + $0xa8] ss:$12 sps:$4 sm:$0xff]   ;;  %v1571_v9 = vld [vmem:[#allocation2 + $0xac] ss:$12 sps:$4 sm:$0xff]  }
  0x11   :  { %110 = vmatpush1.bf16.msra.mxu0 %v1567_v3  ;;  %153 = vmatpush1.bf16.msra.mxu1 %v1568_v4  ;;  %v44_v7 = vpack.c.bf16 %v43_v6, %v42_v5  ;;  %v1572_v10 = vld [vmem:[#allocation2 + $0x228] ss:$12 sps:$4 sm:$0xff]   ;;  %v1574_v11 = vld [vmem:[#allocation2 + $0x22c] ss:$12 sps:$4 sm:$0xff]   ;;  %v1575_v13 = vld [vmem:[#allocation2 + $0x90] ss:$12 sps:$4 sm:$0xff]  }
  0x12   :  { %850 = vmatprep.subr.bf16.mxu0 %v1571_v9  ;;  %v1577_v12 = vld [vmem:[#allocation2 + $0x94] ss:$12 sps:$4 sm:$0xff]   ;;  %893 = vmatprep.subr.bf16.mxu1 %v1574_v11  ;;  %v1578_v15 = vld [vmem:[#allocation2 + $0x210] ss:$12 sps:$4 sm:$0xff]   ;;  %v1581_v18 = vld [vmem:[#allocation2 + $0x78] ss:$12 sps:$4 sm:$0xff]  }
  0x13   :  { %v1580_v14 = vld [vmem:[#allocation2 + $0x214] ss:$12 sps:$4 sm:$0xff]   ;;  %v1583_v16 = vld [vmem:[#allocation2 + $0x7c] ss:$12 sps:$4 sm:$0xff]   ;;  %v1584_v19 = vld [vmem:[#allocation2 + $0x1f8] ss:$12 sps:$4 sm:$0xff]  }
  0x14   :  { %1336 = vmatmul.mubr.msk.bf16.vlgmr.msra.gmra.mxu0 %vm91_vm0, %v44_v7  ;;  %1337 = vmatmul.mubr.msk.bf16.vlgmr.msra.gmra.mxu1 %vm91_vm0, %v44_v7  ;;  %v1586_v17 = vld [vmem:[#allocation2 + $0x1fc] ss:$12 sps:$4 sm:$0xff]   ;;  %v1589_v20 = vld [vmem:[#allocation2 + $0x64] ss:$12 sps:$4 sm:$0xff]   ;;  %v1587_v22 = vld [vmem:[#allocation2 + $0x60] ss:$12 sps:$4 sm:$0xff]  }
  0x15   :  { %851 = vmatpush1.bf16.msra.mxu0 %v1569_v8  ;;  %894 = vmatpush1.bf16.msra.mxu1 %v1572_v10  ;;  %v1592_v21 = vld [vmem:[#allocation2 + $0x1e4] ss:$12 sps:$4 sm:$0xff]   ;;  %v1590_v23 = vld [vmem:[#allocation2 + $0x1e0] ss:$12 sps:$4 sm:$0xff]   ;;  %v1593_v26 = vld [vmem:[#allocation2 + $0x48] ss:$12 sps:$4 sm:$0xff]   ;;  %v51_v10 = vlaneseq }
  0x16   :  { %852 = vmatprep.subr.bf16.mxu0 %v1577_v12  ;;  %895 = vmatprep.subr.bf16.mxu1 %v1580_v14  ;;  %v1595_v24 = vld [vmem:[#allocation2 + $0x4c] ss:$12 sps:$4 sm:$0xff]   ;;  %v1596_v27 = vld [vmem:[#allocation2 + $0x1c8] ss:$12 sps:$4 sm:$0xff]   ;;  %v1599_v30 = vld [vmem:[#allocation2 + $0x30] ss:$12 sps:$4 sm:$0xff]  }
  0x17   :  { %v1598_v25 = vld [vmem:[#allocation2 + $0x1cc] ss:$12 sps:$4 sm:$0xff]   ;;  %v1601_v28 = vld [vmem:[#allocation2 + $0x34] ss:$12 sps:$4 sm:$0xff]   ;;  %v1602_v31 = vld [vmem:[#allocation2 + $0x1b0] ss:$12 sps:$4 sm:$0xff]  }
  0x18   :  { %v1604_v29 = vld [vmem:[#allocation2 + $0x1b4] ss:$12 sps:$4 sm:$0xff]   ;;  %v1607_v32 = vld [vmem:[#allocation2 + $0x1c] ss:$12 sps:$4 sm:$0xff]   ;;  %v1605_v34 = vld [vmem:[#allocation2 + $0x18] ss:$12 sps:$4 sm:$0xff]  }
  0x19   :  { %853 = vmatpush1.bf16.msra.mxu0 %v1575_v13  ;;  %896 = vmatpush1.bf16.msra.mxu1 %v1578_v15  ;;  %v1610_v33 = vld [vmem:[#allocation2 + $0x19c] ss:$12 sps:$4 sm:$0xff]   ;;  %v1608_v35 = vld [vmem:[#allocation2 + $0x198] ss:$12 sps:$4 sm:$0xff]   ;;  %v1611_v38 = vld [vmem:[#allocation2] ss:$12 sps:$4 sm:$0xff]  }
  0x1a   :  { %854 = vmatprep.subr.bf16.mxu0 %v1583_v16  ;;  %897 = vmatprep.subr.bf16.mxu1 %v1586_v17  ;;  %v1613_v36 = vld [vmem:[#allocation2 + $0x4] ss:$12 sps:$4 sm:$0xff]   ;;  %v1614_v39 = vld [vmem:[#allocation2 + $0x180] ss:$12 sps:$4 sm:$0xff]   ;;  %v1617_v42 = vld [vmem:[#allocation2 + $0x168] ss:$12 sps:$4 sm:$0xff]  }
  0x1b   :  { %v1616_v37 = vld [vmem:[#allocation2 + $0x184] ss:$12 sps:$4 sm:$0xff]   ;;  %v1619_v40 = vld [vmem:[#allocation2 + $0x16c] ss:$12 sps:$4 sm:$0xff]   ;;  %v1620_v43 = vld [vmem:[#allocation2 + $0x2e8] ss:$12 sps:$4 sm:$0xff]  }
  0x1c   :  { %v1622_v41 = vld [vmem:[#allocation2 + $0x2ec] ss:$12 sps:$4 sm:$0xff]   ;;  %v1625_v44 = vld [vmem:[#allocation2 + $0x154] ss:$12 sps:$4 sm:$0xff]   ;;  %v1623_v45 = vld [vmem:[#allocation2 + $0x150] ss:$12 sps:$4 sm:$0xff]  }
  0x1d   :  { %855 = vmatpush1.bf16.msra.mxu0 %v1581_v18  ;;  %898 = vmatpush1.bf16.msra.mxu1 %v1584_v19  ;;  %v1628_v46 = vld [vmem:[#allocation2 + $0x2d4] ss:$12 sps:$4 sm:$0xff]   ;;  %v1626_v47 = vld [vmem:[#allocation2 + $0x2d0] ss:$12 sps:$4 sm:$0xff]   ;;  %v1629_v50 = vld [vmem:[#allocation2 + $0x138] ss:$12 sps:$4 sm:$0xff]  }
  0x1e   :  { %856 = vmatprep.subr.bf16.mxu0 %v1589_v20  ;;  %899 = vmatprep.subr.bf16.mxu1 %v1592_v21  ;;  %v1631_v48 = vld [vmem:[#allocation2 + $0x13c] ss:$12 sps:$4 sm:$0xff]   ;;  %v1632_v51 = vld [vmem:[#allocation2 + $0x2b8] ss:$12 sps:$4 sm:$0xff]   ;;  %v1635_v54 = vld [vmem:[#allocation2 + $0x120] ss:$12 sps:$4 sm:$0xff]  }
  0x1f   :  { %v1634_v49 = vld [vmem:[#allocation2 + $0x2bc] ss:$12 sps:$4 sm:$0xff]   ;;  %v1637_v52 = vld [vmem:[#allocation2 + $0x124] ss:$12 sps:$4 sm:$0xff]   ;;  %v1638_v55 = vld [vmem:[#allocation2 + $0x2a0] ss:$12 sps:$4 sm:$0xff]  }
  0x20   :  { %v1640_v53 = vld [vmem:[#allocation2 + $0x2a4] ss:$12 sps:$4 sm:$0xff]   ;;  %v1643_v56 = vld [vmem:[#allocation2 + $0x10c] ss:$12 sps:$4 sm:$0xff]   ;;  %v1641_v58 = vld [vmem:[#allocation2 + $0x108] ss:$12 sps:$4 sm:$0xff]  }
  0x21   :  { %857 = vmatpush1.bf16.msra.mxu0 %v1587_v22  ;;  %900 = vmatpush1.bf16.msra.mxu1 %v1590_v23  ;;  %v1646_v57 = vld [vmem:[#allocation2 + $0x28c] ss:$12 sps:$4 sm:$0xff]   ;;  %v1644_v59 = vld [vmem:[#allocation2 + $0x288] ss:$12 sps:$4 sm:$0xff]   ;;  %v1647_v62 = vld [vmem:[#allocation2 + $0xf0] ss:$12 sps:$4 sm:$0xff]  }
  0x22   :  { %858 = vmatprep.subr.bf16.mxu0 %v1595_v24  ;;  %901 = vmatprep.subr.bf16.mxu1 %v1598_v25  ;;  %v1649_v60 = vld [vmem:[#allocation2 + $0xf4] ss:$12 sps:$4 sm:$0xff]   ;;  %v1650_v63 = vld [vmem:[#allocation2 + $0x270] ss:$12 sps:$4 sm:$0xff]   ;;  %v1653_v2 = vld [vmem:[#allocation2 + $0xd8] ss:$12 sps:$4 sm:$0xff]  }
  0x23   :  { %v1652_v61 = vld [vmem:[#allocation2 + $0x274] ss:$12 sps:$4 sm:$0xff]   ;;  %v1655_v0 = vld [vmem:[#allocation2 + $0xdc] ss:$12 sps:$4 sm:$0xff]   ;;  %v1656_v3 = vld [vmem:[#allocation2 + $0x258] ss:$12 sps:$4 sm:$0xff]  }
  0x24   :  { %v1658_v1 = vld [vmem:[#allocation2 + $0x25c] ss:$12 sps:$4 sm:$0xff]   ;;  %v1661_v4 = vld [vmem:[#allocation2 + $0xc4] ss:$12 sps:$4 sm:$0xff]   ;;  %v1659_v6 = vld [vmem:[#allocation2 + $0xc0] ss:$12 sps:$4 sm:$0xff]  }
  0x25   :  { %859 = vmatpush1.bf16.msra.mxu0 %v1593_v26  ;;  %902 = vmatpush1.bf16.msra.mxu1 %v1596_v27  ;;  %v1664_v5 = vld [vmem:[#allocation2 + $0x244] ss:$12 sps:$4 sm:$0xff]   ;;  %v1662_v7 = vld [vmem:[#allocation2 + $0x240] ss:$12 sps:$4 sm:$0xff]   ;;  %v1839_v11 = vshrl.u32 %v51_v10, 7  ;;  %vm1774_vm1 = vmmov 0  }
  0x26   :  { %860 = vmatprep.subr.bf16.mxu0 %v1601_v28  ;;  %903 = vmatprep.subr.bf16.mxu1 %v1604_v29  ;;  %v1665_v8 = vld [vmem:[#allocation2 + $0x170] ss:$12 sps:$4 sm:$0xff]   ;;  %v49_v16 = vld [vmem:[%s1951_s2] sm:$0xf]  ;;  %vm1312_vm2 = vcmask 31744  }
  0x27   :  { %v1666_v9 = vld [vmem:[#allocation2 + $0x2f0] ss:$12 sps:$4 sm:$0xff]   ;;  %v57_v12 = vsub.s32 1, %v1839_v11  ;;  %v65_v13 = vsub.s32 3, %v1839_v11  ;;  %v53_v14 = vsub.s32 0, %v1839_v11  ;;  %v61_v15 = vsub.s32 2, %v1839_v11 }
  0x28   :  { %v1692_v10 = vld [vmem:[#allocation2 + $0x1a0] ss:$12 sps:$4 sm:$0xff]  }
  0x29   :  { %861 = vmatpush1.bf16.msra.mxu0 %v1599_v30  ;;  %904 = vmatpush1.bf16.msra.mxu1 %v1602_v31  ;;  %v58_v19 = vrot.slane %v49_v16, %v57_v12  ;;  %v66_v20 = vrot.slane %v49_v16, %v65_v13  ;;  %v54_v21 = vrot.slane %v49_v16, %v53_v14  ;;  %v1693_v13 = vld [vmem:[#allocation2 + $0xc8] ss:$12 sps:$4 sm:$0xff]  }
  0x2a   :  { %862 = vmatprep.subr.bf16.mxu0 %v1607_v32  ;;  %905 = vmatprep.subr.bf16.mxu1 %v1610_v33  ;;  %v62_v22 = vrot.slane %v49_v16, %v61_v15  ;;  %v1694_v16 = vld [vmem:[#allocation2 + $0x248] ss:$12 sps:$4 sm:$0xff]  }
  0x2d   :  { %863 = vmatpush1.bf16.msra.mxu0 %v1605_v34  ;;  %906 = vmatpush1.bf16.msra.mxu1 %v1608_v35 }
  0x2e   :  { %864 = vmatprep.subr.bf16.mxu0 %v1613_v36  ;;  %907 = vmatprep.subr.bf16.mxu1 %v1616_v37 }
  0x31   :  { %865 = vmatpush1.bf16.msra.mxu0 %v1611_v38  ;;  %908 = vmatpush1.bf16.msra.mxu1 %v1614_v39 }
  0x32   :  { %866 = vmatprep.subr.bf16.mxu0 %v1619_v40  ;;  %909 = vmatprep.subr.bf16.mxu1 %v1622_v41 }
  0x35   :  { %867 = vmatpush2.bf16.msra.mxu0 %v1617_v42  ;;  %910 = vmatpush2.bf16.msra.mxu1 %v1620_v43 }
  0x36   :  { %868 = vmatprep.subr.bf16.mxu0 %v1625_v44  ;;  %911 = vmatprep.subr.bf16.mxu1 %v1628_v46 }
  0x39   :  { %869 = vmatpush2.bf16.msra.mxu0 %v1623_v45  ;;  %912 = vmatpush2.bf16.msra.mxu1 %v1626_v47  ;;  %v1667_v47 = vld [vmem:[#allocation2 + $0xb0] ss:$12 sps:$4 sm:$0xff]  }
  0x3a   :  { %870 = vmatprep.subr.bf16.mxu0 %v1631_v48  ;;  %913 = vmatprep.subr.bf16.mxu1 %v1634_v49  ;;  %v1668_v48 = vld [vmem:[#allocation2 + $0x230] ss:$12 sps:$4 sm:$0xff]  }
  0x3d   :  { %871 = vmatpush2.bf16.msra.mxu0 %v1629_v50  ;;  %914 = vmatpush2.bf16.msra.mxu1 %v1632_v51  ;;  %v1669_v51 = vld [vmem:[#allocation2 + $0x158] ss:$12 sps:$4 sm:$0xff]  }
  0x3e   :  { %872 = vmatprep.subr.bf16.mxu0 %v1637_v52  ;;  %915 = vmatprep.subr.bf16.mxu1 %v1640_v53  ;;  %v1670_v52 = vld [vmem:[#allocation2 + $0x2d8] ss:$12 sps:$4 sm:$0xff]  }
  0x3f   :  { %v1671_v53 = vld [vmem:[#allocation2 + $0x98] ss:$12 sps:$4 sm:$0xff]  }
  0x41   :  { %873 = vmatpush2.bf16.msra.mxu0 %v1635_v54  ;;  %916 = vmatpush2.bf16.msra.mxu1 %v1638_v55  ;;  %v1672_v54 = vld [vmem:[#allocation2 + $0x218] ss:$12 sps:$4 sm:$0xff]   ;;  %v1673_v55 = vld [vmem:[#allocation2 + $0x140] ss:$12 sps:$4 sm:$0xff]  }
  0x42   :  { %874 = vmatprep.subr.bf16.mxu0 %v1643_v56  ;;  %917 = vmatprep.subr.bf16.mxu1 %v1646_v57  ;;  %v1674_v56 = vld [vmem:[#allocation2 + $0x2c0] ss:$12 sps:$4 sm:$0xff]  }
  0x43   :  { %v1675_v57 = vld [vmem:[#allocation2 + $0x80] ss:$12 sps:$4 sm:$0xff]  }
  0x45   :  { %875 = vmatpush2.bf16.msra.mxu0 %v1641_v58  ;;  %918 = vmatpush2.bf16.msra.mxu1 %v1644_v59  ;;  %v1676_v58 = vld [vmem:[#allocation2 + $0x200] ss:$12 sps:$4 sm:$0xff]   ;;  %v1677_v59 = vld [vmem:[#allocation2 + $0x128] ss:$12 sps:$4 sm:$0xff]  }
  0x46   :  { %876 = vmatprep.subr.bf16.mxu0 %v1649_v60  ;;  %919 = vmatprep.subr.bf16.mxu1 %v1652_v61  ;;  %v1678_v60 = vld [vmem:[#allocation2 + $0x2a8] ss:$12 sps:$4 sm:$0xff]  }
  0x47   :  { %v1679_v61 = vld [vmem:[#allocation2 + $0x68] ss:$12 sps:$4 sm:$0xff]  }
  0x49   :  { %877 = vmatpush2.bf16.msra.mxu0 %v1647_v62  ;;  %920 = vmatpush2.bf16.msra.mxu1 %v1650_v63  ;;  %v1680_v62 = vld [vmem:[#allocation2 + $0x1e8] ss:$12 sps:$4 sm:$0xff]   ;;  %v1681_v63 = vld [vmem:[#allocation2 + $0x110] ss:$12 sps:$4 sm:$0xff]  }
  0x4a   :  { %878 = vmatprep.subr.bf16.mxu0 %v1655_v0  ;;  %921 = vmatprep.subr.bf16.mxu1 %v1658_v1  ;;  %v1682_v0 = vld [vmem:[#allocation2 + $0x290] ss:$12 sps:$4 sm:$0xff]  }
  0x4b   :  { %v1683_v1 = vld [vmem:[#allocation2 + $0x50] ss:$12 sps:$4 sm:$0xff]  }
  0x4d   :  { %879 = vmatpush2.bf16.msra.mxu0 %v1653_v2  ;;  %922 = vmatpush2.bf16.msra.mxu1 %v1656_v3  ;;  %v1684_v2 = vld [vmem:[#allocation2 + $0x1d0] ss:$12 sps:$4 sm:$0xff]   ;;  %v1685_v3 = vld [vmem:[#allocation2 + $0xf8] ss:$12 sps:$4 sm:$0xff]  }
  0x4e   :  { %880 = vmatprep.subr.bf16.mxu0 %v1661_v4  ;;  %923 = vmatprep.subr.bf16.mxu1 %v1664_v5  ;;  %v1686_v4 = vld [vmem:[#allocation2 + $0x278] ss:$12 sps:$4 sm:$0xff]  }
  0x4f   :  { %v1687_v5 = vld [vmem:[#allocation2 + $0x38] ss:$12 sps:$4 sm:$0xff]  }
  0x51   :  { %881 = vmatpush2.bf16.msra.mxu0 %v1659_v6  ;;  %924 = vmatpush2.bf16.msra.mxu1 %v1662_v7  ;;  %v1688_v6 = vld [vmem:[#allocation2 + $0x1b8] ss:$12 sps:$4 sm:$0xff]   ;;  %v1689_v7 = vld [vmem:[#allocation2 + $0xe0] ss:$12 sps:$4 sm:$0xff]  }
  0x52   :  { %1459 = vmatprep.subr.bf16.mxu0 %v1665_v8  ;;  %1481 = vmatprep.subr.bf16.mxu1 %v1666_v9  ;;  %v1690_v8 = vld [vmem:[#allocation2 + $0x260] ss:$12 sps:$4 sm:$0xff]  }
  0x53   :  { %v1691_v9 = vld [vmem:[#allocation2 + $0x20] ss:$12 sps:$4 sm:$0xff]  }
  0xd4   :  { %v129_v17 = vpop.f32.mrf.mxu0  ;;  %v172_v18 = vpop.f32.mrf.mxu1 }
  0xd5   :  { %v130_v31 = vadd.f32 %v129_v17, %v54_v21  ;;  %v173_v32 = vadd.f32 %v172_v18, %v62_v22  ;;  %v1695_v17 = vld [vmem:[#allocation2 + $0x8] ss:$12 sps:$4 sm:$0xff]  }
  0xd6   :  { %v131_v23 = vpop.f32.mrf.mxu0  ;;  %v174_v24 = vpop.f32.mrf.mxu1  ;;  %v1696_v18 = vld [vmem:[#allocation2 + $0x188] ss:$12 sps:$4 sm:$0xff]  }
  0xd7   :  { %v132_v27 = vadd.f32 %v131_v23, %v58_v19  ;;  %v175_v28 = vadd.f32 %v174_v24, %v66_v20  ;;  %v181_v43 = vmax.f32 %v130_v31, 0.0  ;;  %v183_v44 = vmax.f32 %v173_v32, 0.0  ;;  %v1701_v23 = vld [vmem:[%s1954_s5 + $0x68] sm:$0xff]  }
  0xd8   :  { %v133_v25 = vpop.f32.mrf.mxu0  ;;  %v176_v26 = vpop.f32.mrf.mxu1  ;;  %v1702_v24 = vld [vmem:[%s1954_s5 + $0x28] sm:$0xff]  }
  0xd9   :  { %v134_v29 = vadd.f32 %v133_v25, %v54_v21  ;;  %v177_v30 = vadd.f32 %v176_v26, %v62_v22  ;;  %v182_v39 = vmax.f32 %v132_v27, 0.0  ;;  %v184_v40 = vmax.f32 %v175_v28, 0.0  ;;  %v1699_v21 = vld [vmem:[%s1954_s5 + $0x70] sm:$0xff]   ;;  %v1703_v25 = vld [vmem:[%s1954_s5 + $0x60] sm:$0xff]   ;;  %v1705_v27 = vld [vmem:[%s1954_s5 + $0x58] sm:$0xff]  }
  0xda   :  { %v135_v33 = vpop.f32.mrf.mxu0  ;;  %v178_v34 = vpop.f32.mrf.mxu1  ;;  %v1700_v22 = vld [vmem:[%s1954_s5 + $0x30] sm:$0xff]   ;;  %v1704_v26 = vld [vmem:[%s1954_s5 + $0x20] sm:$0xff]   ;;  %v1706_v28 = vld [vmem:[%s1954_s5 + $0x18] sm:$0xff]  }
  0xdb   :  { %v136_v35 = vadd.f32 %v135_v33, %v58_v19  ;;  %v179_v36 = vadd.f32 %v178_v34, %v66_v20  ;;  %v185_v37 = vmax.f32 %v134_v29, 0.0  ;;  %v187_v38 = vmax.f32 %v177_v30, 0.0  ;;  %v1697_v19 = vld [vmem:[%s1954_s5 + $0x78] sm:$0xff]   ;;  %v1707_v29 = vld [vmem:[%s1954_s5 + $0x50] sm:$0xff]   ;;  %v1709_v31 = vld [vmem:[%s1954_s5 + $0x48] sm:$0xff]  }
  0xdc   :  { %v1698_v20 = vld [vmem:[%s1954_s5 + $0x38] sm:$0xff]   ;;  %v1708_v30 = vld [vmem:[%s1954_s5 + $0x10] sm:$0xff]   ;;  %v1710_v32 = vld [vmem:[%s1954_s5 + $0x8] sm:$0xff]  }
  0xdd   :  { %v186_v41 = vmax.f32 %v136_v35, 0.0  ;;  %v188_v42 = vmax.f32 %v179_v36, 0.0  ;;  %v1854_v49 = vpack.c.bf16 %v185_v37, %v181_v43  ;;  %v1856_v50 = vpack.c.bf16 %v187_v38, %v183_v44  ;;  %v1711_v33 = vld [vmem:[%s1954_s5 + $0x40] sm:$0xff]   ;;  %v1713_v35 = vld [vmem:[%s1954_s5 + $0xb8] sm:$0xff]   ;;  %v1714_v37 = vld [vmem:[%s1954_s5 + $0xb0] sm:$0xff]  }
  0xde   :  { %v1712_v34 = vld [vmem:[%s1954_s5] sm:$0xff]   ;;  %v1773_v36 = vmov 0.0   ;;  %v1715_v38 = vld [vmem:[%s1954_s5 + $0xa8] sm:$0xff]  }
  0xdf   :  { %v190_v45 = vpack.c.bf16 %v186_v41, %v182_v39  ;;  %v192_v46 = vpack.c.bf16 %v188_v42, %v184_v40  ;;  %v1716_v39 = vld [vmem:[%s1954_s5 + $0xa0] sm:$0xff]   ;;  %v1717_v40 = vld [vmem:[%s1954_s5 + $0x98] sm:$0xff]   ;;  %v1718_v41 = vld [vmem:[%s1954_s5 + $0x90] sm:$0xff]  }
  0xe0   :  { %v1719_v42 = vld [vmem:[%s1954_s5 + $0x88] sm:$0xff]   ;;  %v1720_v43 = vld [vmem:[%s1954_s5 + $0x80] sm:$0xff]  }
  0xe1   :  { %882 = vmatprep.mubr.bf16.mxu0 %v190_v45  ;;  %925 = vmatprep.mubr.bf16.mxu1 %v192_v46  ;;  %v321_v44 = vld [vmem:[%s1953_s4] sm:$0x7] }
  0xe2   :  { %883 = vmatmul.mubr.bf16.vlgmr.msra.gmra.mxu0 %v1854_v49  ;;  %926 = vmatmul.mubr.bf16.vlgmr.msra.gmra.mxu1 %v1856_v50 }
  0xe3   :  { %1460 = vmatpush3.bf16.msra.mxu0 %v1667_v47  ;;  %1482 = vmatpush3.bf16.msra.mxu1 %v1668_v48 }
  0xe4   :  { %968 = vmatprep.mubr.bf16.mxu0 %v190_v45  ;;  %1009 = vmatprep.mubr.bf16.mxu1 %v192_v46  ;;  %v330_v45 = vrot.slane %v321_v44, %v57_v12  ;;  %v326_v46 = vrot.slane %v321_v44, %v53_v14 }
  0xe5   :  { %1461 = vmatprep.subr.bf16.mxu0 %v1669_v51  ;;  %1483 = vmatprep.subr.bf16.mxu1 %v1670_v52 }
  0xe7   :  { %1462 = vmatpush3.bf16.msra.mxu0 %v1671_v53  ;;  %1484 = vmatpush3.bf16.msra.mxu1 %v1672_v54 }
  0xe8   :  { %1463 = vmatprep.subr.bf16.mxu0 %v1673_v55  ;;  %1485 = vmatprep.subr.bf16.mxu1 %v1674_v56 }
  0xeb   :  { %1464 = vmatpush3.bf16.msra.mxu0 %v1675_v57  ;;  %1486 = vmatpush3.bf16.msra.mxu1 %v1676_v58 }
  0xec   :  { %1465 = vmatprep.subr.bf16.mxu0 %v1677_v59  ;;  %1487 = vmatprep.subr.bf16.mxu1 %v1678_v60 }
  0xef   :  { %1466 = vmatpush3.bf16.msra.mxu0 %v1679_v61  ;;  %1488 = vmatpush3.bf16.msra.mxu1 %v1680_v62 }
  0xf0   :  { %1467 = vmatprep.subr.bf16.mxu0 %v1681_v63  ;;  %1489 = vmatprep.subr.bf16.mxu1 %v1682_v0 }
  0xf3   :  { %1468 = vmatpush3.bf16.msra.mxu0 %v1683_v1  ;;  %1490 = vmatpush3.bf16.msra.mxu1 %v1684_v2 }
  0xf4   :  { %1469 = vmatprep.subr.bf16.mxu0 %v1685_v3  ;;  %1491 = vmatprep.subr.bf16.mxu1 %v1686_v4 }
  0xf7   :  { %1470 = vmatpush3.bf16.msra.mxu0 %v1687_v5  ;;  %1492 = vmatpush3.bf16.msra.mxu1 %v1688_v6  ;;  %v334_v5 = vrot.slane %v321_v44, %v61_v15 }
  0xf8   :  { %1471 = vmatprep.subr.bf16.mxu0 %v1689_v7  ;;  %1493 = vmatprep.subr.bf16.mxu1 %v1690_v8 }
  0xfb   :  { %1472 = vmatpush3.bf16.msra.mxu0 %v1691_v9  ;;  %1494 = vmatpush3.bf16.msra.mxu1 %v1692_v10 }
  0xfc   :  { %1473 = vmatprep.subr.bf16.mxu0 %v1693_v13  ;;  %1495 = vmatprep.subr.bf16.mxu1 %v1694_v16 }
  0xff   :  { %1474 = vmatpush3.bf16.msra.mxu0 %v1695_v17  ;;  %1496 = vmatpush3.bf16.msra.mxu1 %v1696_v18 }
 0x100   :  { %1503 = vmatprep.subr.bf16.mxu0 %v1697_v19  ;;  %1534 = vmatprep.subr.bf16.mxu1 %v1773_v36 }
 0x102   :  { %969 = vmatmul.mubr.bf16.vlgmr.msra.gmra.mxu0 %v1854_v49  ;;  %1010 = vmatmul.mubr.bf16.vlgmr.msra.gmra.mxu1 %v1856_v50 }
 0x103   :  { %1504 = vmatpush3.bf16.msra.mxu0 %v1698_v20  ;;  %1535 = vmatpush3.bf16.msra.mxu1 %v1713_v35 }
 0x104   :  { %1505 = vmatprep.subr.bf16.mxu0 %v1699_v21  ;;  %1536 = vmatprep.subr.bf16.mxu1 %v1773_v36 }
 0x105   :  { %1550 = vmatprep.mubr.msk.bf16.mxu1 %vm1774_vm1, %v1773_v36 }
 0x107   :  { %1506 = vmatpush3.bf16.msra.mxu0 %v1700_v22  ;;  %1537 = vmatpush3.bf16.msra.mxu1 %v1714_v37 }
 0x108   :  { %1507 = vmatprep.subr.bf16.mxu0 %v1701_v23  ;;  %1538 = vmatprep.subr.bf16.mxu1 %v1773_v36 }
 0x10b   :  { %1508 = vmatpush3.bf16.msra.mxu0 %v1702_v24  ;;  %1539 = vmatpush3.bf16.msra.mxu1 %v1715_v38 }
 0x10c   :  { %1509 = vmatprep.subr.bf16.mxu0 %v1703_v25  ;;  %1540 = vmatprep.subr.bf16.mxu1 %v1773_v36 }
 0x10f   :  { %1510 = vmatpush3.bf16.msra.mxu0 %v1704_v26  ;;  %1541 = vmatpush3.bf16.msra.mxu1 %v1716_v39 }
 0x110   :  { %1511 = vmatprep.subr.bf16.mxu0 %v1705_v27  ;;  %1542 = vmatprep.subr.bf16.mxu1 %v1773_v36 }
 0x113   :  { %1512 = vmatpush3.bf16.msra.mxu0 %v1706_v28  ;;  %1543 = vmatpush3.bf16.msra.mxu1 %v1717_v40 }
 0x114   :  { %1513 = vmatprep.subr.bf16.mxu0 %v1707_v29  ;;  %1544 = vmatprep.subr.bf16.mxu1 %v1773_v36 }
 0x117   :  { %1514 = vmatpush3.bf16.msra.mxu0 %v1708_v30  ;;  %1545 = vmatpush3.bf16.msra.mxu1 %v1718_v41  ;;  %v1434_v30 = vld [vmem:[%s1955_s6] ss:$0 sm:$0xff] }
 0x118   :  { %1515 = vmatprep.subr.bf16.mxu0 %v1709_v31  ;;  %1546 = vmatprep.subr.bf16.mxu1 %v1773_v36 }
 0x11b   :  { %1516 = vmatpush3.bf16.msra.mxu0 %v1710_v32  ;;  %1547 = vmatpush3.bf16.msra.mxu1 %v1719_v42 }
 0x11c   :  { %1517 = vmatprep.subr.bf16.mxu0 %v1711_v33  ;;  %1548 = vmatprep.subr.bf16.mxu1 %v1773_v36 }
 0x11f   :  { %1518 = vmatpush3.bf16.msra.mxu0 %v1712_v34  ;;  %1549 = vmatpush3.bf16.msra.mxu1 %v1720_v43 }
 0x1a2   :  { %v884_v47 = vpop.f32.mrf.mxu0  ;;  %v927_v48 = vpop.f32.mrf.mxu1 }
 0x1a3   :  { %v885_v52 = vadd.f32 %v884_v47, %v326_v46 }
 0x1a4   :  { %v886_v49 = vpop.f32.mrf.mxu0  ;;  %v929_v50 = vpop.f32.mrf.mxu1 }
 0x1a5   :  { %v887_v51 = vadd.f32 %v886_v49, %v330_v45  ;;  %v928_v60 = vadd.f32 %v927_v48, %v885_v52 }
 0x1a6   :  { %v888_v53 = vpop.f32.mrf.mxu0  ;;  %v931_v54 = vpop.f32.mrf.mxu1 }
 0x1a7   :  { %v889_v55 = vadd.f32 %v888_v53, %v326_v46  ;;  %v930_v57 = vadd.f32 %v929_v50, %v887_v51  ;;  %v1018_v14 = vmax.f32 %v928_v60, 0.0 }
 0x1a8   :  { %v890_v56 = vpop.f32.mrf.mxu0  ;;  %v933_v61 = vpop.f32.mrf.mxu1 }
 0x1a9   :  { %v932_v58 = vadd.f32 %v931_v54, %v889_v55  ;;  %v891_v59 = vadd.f32 %v890_v56, %v330_v45  ;;  %v1019_v63 = vmax.f32 %v930_v57, 0.0 }
 0x1ab   :  { %v934_v62 = vadd.f32 %v933_v61, %v891_v59  ;;  %v1021_v12 = vmax.f32 %v932_v58, 0.0 }
 0x1ad   :  { %v1022_v0 = vmax.f32 %v934_v62, 0.0  ;;  %v1024_v2 = vpack.c.bf16 %v1021_v12, %v1018_v14 }
 0x1af   :  { %v1025_v1 = vpack.c.bf16 %v1022_v0, %v1019_v63 }
 0x1b1   :  { %1258 = vmatprep.mubr.bf16.mxu0 %v1025_v1 }
 0x1b2   :  { %1259 = vmatmul.mubr.bf16.vlgmr.msra.gmra.mxu0 %v1024_v2 }
 0x1c2   :  { %v1475_v3 = vpop.f32.mrf.mxu0  ;;  %v1497_v4 = vpop.f32.mrf.mxu1 }
 0x1c4   :  { %v1476_v6 = vpop.f32.mrf.mxu0  ;;  %v1498_v7 = vpop.f32.mrf.mxu1 }
 0x1c5   :  { %v1477_v8 = vadd.f32 %v1476_v6, %v1475_v3  ;;  %v1499_v18 = vadd.f32 %v1498_v7, %v1497_v4 }
 0x1c6   :  { %v1478_v9 = vpop.f32.mrf.mxu0  ;;  %v1500_v10 = vpop.f32.mrf.mxu1 }
 0x1c7   :  { %v971_v13 = vadd.f32 %v1477_v8, %v334_v5 }
 0x1c8   :  { %v1479_v16 = vpop.f32.mrf.mxu0  ;;  %v1501_v17 = vpop.f32.mrf.mxu1 }
 0x1c9   :  { %v1480_v19 = vadd.f32 %v1479_v16, %v1478_v9  ;;  %v1012_v20 = vadd.f32 %v1499_v18, %v971_v13  ;;  %v1502_v22 = vadd.f32 %v1501_v17, %v1500_v10 }
 0x1cb   :  { %v974_v21 = vadd.f32 %v1480_v19, %v334_v5  ;;  %v1020_v24 = vmax.f32 %v1012_v20, 0.0 }
 0x1cd   :  { %v1015_v23 = vadd.f32 %v1502_v22, %v974_v21 }
 0x1cf   :  { %v1023_v25 = vmax.f32 %v1015_v23, 0.0 }
 0x1d1   :  { %v1026_v26 = vpack.c.bf16 %v1023_v25, %v1020_v24 }
 0x1d3   :  { %1551 = vmatmul.mubr.bf16.vlgmr.msra.gmra.mxu1 %v1026_v26 }
 0x272   :  { %v1519_v11 = vpop.f32.mrf.mxu0 }
 0x274   :  { %v1520_v15 = vpop.f32.mrf.mxu0 }
 0x275   :  { %v1521_v28 = vadd.f32 %v1520_v15, %v1519_v11 }
 0x276   :  { %v1522_v27 = vpop.f32.mrf.mxu0 }
 0x277   :  { %v1261_v32 = vadd.f32 %v1521_v28, %v1434_v30 }
 0x278   :  { %v1523_v29 = vpop.f32.mrf.mxu0 }
 0x279   :  { %v1524_v31 = vadd.f32 %v1523_v29, %v1522_v27 }
 0x27b   :  { %v1264_v36 = vadd.f32 %v1524_v31, %v1434_v30 }
 0x293   :  { %v1301_v33 = vpop.f32.mrf.mxu1 }
 0x294   :  { %v1302_v34 = vadd.f32 %v1301_v33, %v1261_v32 }
 0x295   :  { %v1552_v35 = vpop.f32.mrf.mxu1 }
 0x296   :  { %1721 = vtanh.f32 %v1302_v34 }
 0x297   :  { %v1304_v37 = vpop.f32.mrf.mxu1 }
 0x298   :  { %v1305_v38 = vadd.f32 %v1304_v37, %v1264_v36 }
 0x299   :  { %v1553_v39 = vpop.f32.mrf.mxu1 }
 0x29a   :  { %1723 = vtanh.f32 %v1305_v38 }
 0x2a3   :  { %v1722_v40 = vpop.eup %1721 }
 0x2a4   :  { %v1310_v41 = vmul.f32 2.0, %v1722_v40 }
 0x2a6   :  { %1313 = vst.msk [vmem:[#allocation5] sm:$0xff] %vm1312_vm2, %v1310_v41 }
 0x2a7   :  { %v1724_v42 = vpop.eup %1723 }
 0x2a8   :  { %v1311_v43 = vmul.f32 2.0, %v1724_v42 }
 0x2aa   :  { %1314 = vst.msk [vmem:[#allocation5 + $0x8] sm:$0xff] %vm1312_vm2, %v1311_v43 }
 0x2ab   :  { %1319 = vsyncadd [#allocation4], 224  ;;  %s1775_s6 = smov [#allocation5]  }
 0x2ac   :  { %s1320_s17 = sshll.u32 %s1775_s6, 4  ;;  %s1321_s17 = int_to_ptr.vmem [resolvable:$true] %s1320_s17 }
 0x2ad   :  { %s1745_s18 = scalar_lea.vmem %s1321_s17, 32  ;;  %s1749_s0 = scalar_lea.vmem %s1321_s17, 256 }
 0x2ae   :  { %p1746_p5 = scmp.ne.s32.totalorder %s1321_s17, %s1745_s18  ;;  %p1750_p6 = scmp.lt.s32.totalorder %s1321_s17, %s1321_s17 }
 0x2af   :  { %p1751_p7 = scmp.lt.s32.totalorder %s1749_s0, %s1745_s18 }
 0x2b1   :  { %p1752_p8 = por %p1751_p7, %p1750_p6 }
 0x2b3   :  { %p1753_p9 = pnand %p1752_p8, %p1746_p5 }
 0x2b5   :  { %1756 = shalt.err (!%p1753_p9)
}
 0x2b6   :  { %s1776_s1 = smov 32   ;;  %s1777_s2 = smov 2  }
 0x2b7   :  { %1326 = dma.vmem_to_hbm [thread:$0]  %s1321_s17, 32, %s1956_s7, [#allocation4], %s1776_s1, %s1776_s1, %s1777_s2  }
 0x2b8   :  { %1767 = dma.done.wait [#allocation4], 256  }
 0x2b9   :  { %1768 = vsyncadd [#allocation4], 4294967040 }
 0x2ba   :  { %1330 = vsyncpa [#allocation3], 1 }
 0x2bb   :  { %1331 = vsyncpa [#allocation4], 1 }

</bundles_post_ra>
